<compile_context>
chip_gen: v7x
topology: tpu7x:2x2x1
jax: 0.10.0
libtpu: 0.0.40
codegen_flags: <defaults>
</compile_context>

<pallas_src>
import jax
import jax.numpy as jnp
from jax import lax
from jax.experimental import pallas as pl
from jax.experimental.pallas import tpu as pltpu

# ----------------------------- sizes (small, consistent with the module) ----
B = 4              # batch
B_PAD = 8          # batch padded to a full sublane group
C_IN = 3           # image channels
HW = 16            # spatial (16x16 image)
S_SPATIAL = HW * HW
F_ENC = 256        # encoder feature dim   (2048 in the real module)
E_DIM = 128        # embedding dim         (512 in the real module)
H_DIM = 128        # LSTM hidden dim       (512 in the real module)
VOCAB = 128        # vocab size            (len(tokenizer) in the real module)
SEQ = 8            # caption length
T_PAD = SEQ - 1    # static number of decode steps (max possible)


# ----------------------------- fused forward kernel -------------------------
def caption_kernel(x_ref, emb_ref,
                   w_enc_ref, b_enc_ref,
                   w_ih0_ref, b_ih0_ref, w_ic0_ref, b_ic0_ref,
                   w_ih_ref, b_ih_ref, w_hh_ref, b_hh_ref,
                   w_fc_ref, b_fc_ref,
                   pred_ref,
                   h_hist, xw_pre):
    # ---- encoder surrogate: global-average-pool + Linear + ReLU ------------
    pooled = jnp.mean(x_ref[...], axis=-1)                          # (Bp, C)
    feat = jnp.dot(pooled, w_enc_ref[...],
                   preferred_element_type=jnp.float32) + b_enc_ref[...]
    enc = jnp.maximum(feat, 0.0)                                    # (Bp, F)
    enc_bf = enc.astype(jnp.bfloat16)

    # ---- init_h / init_c ----------------------------------------------------
    h0 = jnp.dot(enc_bf, w_ih0_ref[...],
                 preferred_element_type=jnp.float32) + b_ih0_ref[...]
    c0 = jnp.dot(enc_bf, w_ic0_ref[...],
                 preferred_element_type=jnp.float32) + b_ic0_ref[...]

    # ---- hoisted input projection for ALL timesteps at once ----------------
    # (T*Bp, E) @ (E, 4H)  -> stays in VMEM scratch for the recurrence.
    xw_pre[...] = (jnp.dot(emb_ref[...], w_ih_ref[...],
                           preferred_element_type=jnp.float32)
                   + b_ih_ref[...])

    # ---- LSTM recurrence (only h @ W_hh on the serial critical path) -------
    def step(t, carry):
        h, c = carry
        r0 = pl.multiple_of(t * B_PAD, B_PAD)
        gates = (xw_pre[pl.ds(r0, B_PAD), :]
                 + jnp.dot(h.astype(jnp.bfloat16), w_hh_ref[...],
                           preferred_element_type=jnp.float32)
                 + b_hh_ref[...])
        i_g = jax.nn.sigmoid(gates[:, 0 * H_DIM:1 * H_DIM])
        f_g = jax.nn.sigmoid(gates[:, 1 * H_DIM:2 * H_DIM])
        g_g = jnp.tanh(gates[:, 2 * H_DIM:3 * H_DIM])
        o_g = jax.nn.sigmoid(gates[:, 3 * H_DIM:4 * H_DIM])
        c_new = f_g * c + i_g * g_g
        h_new = o_g * jnp.tanh(c_new)
        h_hist[pl.ds(r0, B_PAD), :] = h_new
        return (h_new, c_new)

    lax.fori_loop(0, T_PAD, step, (h0, c0), unroll=True)

    # ---- deferred FC over all timesteps (one batched matmul) ---------------
    # Dropout p=0.0 is the identity.
    pred_ref[...] = (jnp.dot(h_hist[...].astype(jnp.bfloat16), w_fc_ref[...],
                             preferred_element_type=jnp.float32)
                     + b_fc_ref[...])


# ----------------------------- CaptionModel.forward -------------------------
def caption_model_forward(x, captions, caplens, params):
    """Mirrors CaptionModel.forward (encoder is a surrogate, dropout=0)."""
    caplens_sq = caplens[:, 0]
    sort_idx = jnp.argsort(-caplens_sq)                  # descending sort
    caplens_sorted = caplens_sq[sort_idx]
    caplens_m1 = caplens_sorted - 1
    cap_sorted = captions[sort_idx]
    x_sorted = x[sort_idx]                               # permute before encoder

    # Static-shape preprocessing: the kernel always runs T_PAD steps so it
    # compiles exactly once regardless of the caplens distribution.
    x_flat = x_sorted.reshape(B, C_IN, S_SPATIAL).astype(jnp.float32)
    x_flat = jnp.pad(x_flat, ((0, B_PAD - B), (0, 0), (0, 0)))

    emb = params["emb"][cap_sorted]                      # (B, SEQ, E) lookup
    emb_t = jnp.transpose(emb[:, :T_PAD, :], (1, 0, 2))  # (T, B, E)
    emb_t = jnp.pad(emb_t, ((0, 0), (0, B_PAD - B), (0, 0)))
    emb_flat = emb_t.reshape(T_PAD * B_PAD, E_DIM).astype(jnp.bfloat16)

    bf = lambda a: a.astype(jnp.bfloat16)                # bf16 MXU inputs

    preds_flat = pl.pallas_call(
        caption_kernel,
        out_shape=jax.ShapeDtypeStruct((T_PAD * B_PAD, VOCAB), jnp.float32),
        grid_spec=pltpu.PrefetchScalarGridSpec(
            num_scalar_prefetch=0,
            grid=(1,),
            in_specs=[
                pl.BlockSpec((B_PAD, C_IN, S_SPATIAL), lambda i: (0, 0, 0)),   # x
                pl.BlockSpec((T_PAD * B_PAD, E_DIM), lambda i: (0, 0)),        # emb
                pl.BlockSpec((C_IN, F_ENC), lambda i: (0, 0)),                 # enc W
                pl.BlockSpec((1, F_ENC), lambda i: (0, 0)),                    # enc b
                pl.BlockSpec((F_ENC, H_DIM), lambda i: (0, 0)),                # init_h W
                pl.BlockSpec((1, H_DIM), lambda i: (0, 0)),                    # init_h b
                pl.BlockSpec((F_ENC, H_DIM), lambda i: (0, 0)),                # init_c W
                pl.BlockSpec((1, H_DIM), lambda i: (0, 0)),                    # init_c b
                pl.BlockSpec((E_DIM, 4 * H_DIM), lambda i: (0, 0)),            # W_ih
                pl.BlockSpec((1, 4 * H_DIM), lambda i: (0, 0)),                # b_ih
                pl.BlockSpec((H_DIM, 4 * H_DIM), lambda i: (0, 0)),            # W_hh
                pl.BlockSpec((1, 4 * H_DIM), lambda i: (0, 0)),                # b_hh
                pl.BlockSpec((H_DIM, VOCAB), lambda i: (0, 0)),                # W_fc
                pl.BlockSpec((1, VOCAB), lambda i: (0, 0)),                    # b_fc
            ],
            out_specs=pl.BlockSpec((T_PAD * B_PAD, VOCAB), lambda i: (0, 0)),
            scratch_shapes=[
                pltpu.VMEM((T_PAD * B_PAD, H_DIM), jnp.float32),      # h history
                pltpu.VMEM((T_PAD * B_PAD, 4 * H_DIM), jnp.float32),  # x@W_ih+b
            ],
        ),
        compiler_params=pltpu.CompilerParams(
            dimension_semantics=("arbitrary",),
            vmem_limit_bytes=32 * 1024 * 1024),
    )(x_flat, emb_flat,
      params["w_enc"], params["b_enc"],
      bf(params["w_init_h"]), params["b_init_h"],
      bf(params["w_init_c"]), params["b_init_c"],
      bf(params["w_ih"]), params["b_ih"],
      bf(params["w_hh"]), params["b_hh"],
      bf(params["w_fc"]), params["b_fc"])

    # (T*Bp, V) -> (B, T_PAD, V): drop batch padding, put batch first.
    preds_bt = jnp.transpose(
        preds_flat.reshape(T_PAD, B_PAD, VOCAB), (1, 0, 2))[:B]

    # Host-side slice to max(caplens)-1, OUTSIDE the kernel, so the Pallas
    # kernel never recompiles for a different caplens distribution.
    t_max = int(jnp.max(caplens_m1))
    t_idx = jnp.arange(t_max)[None, :, None]
    mask = t_idx < caplens_m1[:, None, None]
    # Rows past their caption length are zero, exactly like the zero-init
    # predictions tensor in the PyTorch loop.
    predictions = jnp.where(mask, preds_bt[:, :t_max, :], 0.0)
    return predictions, cap_sorted, caplens_m1, sort_idx


# ----------------------------- parameter init (deterministic) ---------------
def init_params(key):
    ks = jax.random.split(key, 12)
    s = 0.05
    # Weights are stored transposed vs. PyTorch (in, out) so kernels do x @ W.
    return {
        "w_enc": s * jax.random.normal(ks[0], (C_IN, F_ENC), jnp.float32),
        "b_enc": s * jax.random.normal(ks[1], (1, F_ENC), jnp.float32),
        "emb": s * jax.random.normal(ks[2], (VOCAB, E_DIM), jnp.float32),
        "w_init_h": s * jax.random.normal(ks[3], (F_ENC, H_DIM), jnp.float32),
        "b_init_h": s * jax.random.normal(ks[4], (1, H_DIM), jnp.float32),
        "w_init_c": s * jax.random.normal(ks[5], (F_ENC, H_DIM), jnp.float32),
        "b_init_c": s * jax.random.normal(ks[6], (1, H_DIM), jnp.float32),
        # LSTMCell gate order (i, f, g, o) packed along the output axis.
        "w_ih": s * jax.random.normal(ks[7], (E_DIM, 4 * H_DIM), jnp.float32),
        "b_ih": s * jax.random.normal(ks[8], (1, 4 * H_DIM), jnp.float32),
        "w_hh": s * jax.random.normal(ks[9], (H_DIM, 4 * H_DIM), jnp.float32),
        "b_hh": s * jax.random.normal(ks[10], (1, 4 * H_DIM), jnp.float32),
        "w_fc": s * jax.random.normal(ks[11], (H_DIM, VOCAB), jnp.float32),
        "b_fc": jnp.zeros((1, VOCAB), jnp.float32),
    }


if __name__ == "__main__":
    key = jax.random.PRNGKey(0)
    pkey, xkey, ckey = jax.random.split(key, 3)
    params = init_params(pkey)

    x = jax.random.normal(xkey, (B, C_IN, HW, HW), jnp.float32)       # NCHW
    captions = jax.random.randint(ckey, (B, SEQ), 0, VOCAB, jnp.int32)
    caplens = jnp.array([[5], [8], [3], [6]], dtype=jnp.int32)        # (B, 1)

    predictions, cap_sorted, caplens_m1, sort_idx = caption_model_forward(
        x, captions, caplens, params)

    jax.block_until_ready(predictions)
    jax.block_until_ready(cap_sorted)
    jax.block_until_ready(sort_idx)

    assert predictions.shape == (B, int(jnp.max(caplens_m1)), VOCAB)
    print("KERNEL_OK")
</pallas_src>

<mosaic_0001>
module attributes {stable_mosaic.version = 11 : i64} {
  func.func @caption_kernel(%arg0: i32, %arg1: memref<8x3x256xf32, #tpu.memory_space<vmem>>, %arg2: memref<56x128xbf16, #tpu.memory_space<vmem>>, %arg3: memref<3x256xf32, #tpu.memory_space<vmem>>, %arg4: memref<1x256xf32, #tpu.memory_space<vmem>>, %arg5: memref<256x128xbf16, #tpu.memory_space<vmem>>, %arg6: memref<1x128xf32, #tpu.memory_space<vmem>>, %arg7: memref<256x128xbf16, #tpu.memory_space<vmem>>, %arg8: memref<1x128xf32, #tpu.memory_space<vmem>>, %arg9: memref<128x512xbf16, #tpu.memory_space<vmem>>, %arg10: memref<1x512xf32, #tpu.memory_space<vmem>>, %arg11: memref<128x512xbf16, #tpu.memory_space<vmem>>, %arg12: memref<1x512xf32, #tpu.memory_space<vmem>>, %arg13: memref<128x128xbf16, #tpu.memory_space<vmem>>, %arg14: memref<1x128xf32, #tpu.memory_space<vmem>>, %arg15: memref<56x128xf32, #tpu.memory_space<vmem>>, %arg16: memref<56x128xf32, #tpu.memory_space<vmem>>, %arg17: memref<56x512xf32, #tpu.memory_space<vmem>>) attributes {dimension_semantics = [#tpu.dimension_semantics<arbitrary>], iteration_bounds = array<i64: 1>, scalar_prefetch = 0 : i64, scratch_operands = 2 : i64, tpu.core_type = #tpu.core_type<tc>, window_params = [{pipeline_mode = #tpu.pipeline_mode<synchronous>, transform_indices = @transform_0, window_bounds = array<i64: 8, 3, 256>}, {pipeline_mode = #tpu.pipeline_mode<synchronous>, transform_indices = @transform_1, window_bounds = array<i64: 56, 128>}, {pipeline_mode = #tpu.pipeline_mode<synchronous>, transform_indices = @transform_2, window_bounds = array<i64: 3, 256>}, {pipeline_mode = #tpu.pipeline_mode<synchronous>, transform_indices = @transform_3, window_bounds = array<i64: 1, 256>}, {pipeline_mode = #tpu.pipeline_mode<synchronous>, transform_indices = @transform_4, window_bounds = array<i64: 256, 128>}, {pipeline_mode = #tpu.pipeline_mode<synchronous>, transform_indices = @transform_5, window_bounds = array<i64: 1, 128>}, {pipeline_mode = #tpu.pipeline_mode<synchronous>, transform_indices = @transform_6, window_bounds = array<i64: 256, 128>}, {pipeline_mode = #tpu.pipeline_mode<synchronous>, transform_indices = @transform_7, window_bounds = array<i64: 1, 128>}, {pipeline_mode = #tpu.pipeline_mode<synchronous>, transform_indices = @transform_8, window_bounds = array<i64: 128, 512>}, {pipeline_mode = #tpu.pipeline_mode<synchronous>, transform_indices = @transform_9, window_bounds = array<i64: 1, 512>}, {pipeline_mode = #tpu.pipeline_mode<synchronous>, transform_indices = @transform_10, window_bounds = array<i64: 128, 512>}, {pipeline_mode = #tpu.pipeline_mode<synchronous>, transform_indices = @transform_11, window_bounds = array<i64: 1, 512>}, {pipeline_mode = #tpu.pipeline_mode<synchronous>, transform_indices = @transform_12, window_bounds = array<i64: 128, 128>}, {pipeline_mode = #tpu.pipeline_mode<synchronous>, transform_indices = @transform_13, window_bounds = array<i64: 1, 128>}, {pipeline_mode = #tpu.pipeline_mode<synchronous>, transform_indices = @transform_14, window_bounds = array<i64: 56, 128>}]} {
    %c0 = arith.constant 0 : index
    %c0_0 = arith.constant 0 : index
    %c0_1 = arith.constant 0 : index
    %0 = vector.load %arg1[%c0, %c0_0, %c0_1] : memref<8x3x256xf32, #tpu.memory_space<vmem>>, vector<8x3x256xf32>
    %cst = arith.constant dense<0.000000e+00> : vector<8x3xf32>
    %1 = vector.multi_reduction <add>, %0, %cst [2] : vector<8x3x256xf32> to vector<8x3xf32>
    %cst_2 = arith.constant 2.560000e+02 : f32
    %2 = vector.broadcast %cst_2 : f32 to vector<8x3xf32>
    %3 = arith.divf %1, %2 : vector<8x3xf32>
    %c0_3 = arith.constant 0 : index
    %c0_4 = arith.constant 0 : index
    %4 = vector.load %arg3[%c0_3, %c0_4] : memref<3x256xf32, #tpu.memory_space<vmem>>, vector<3x256xf32>
    %cst_5 = arith.constant dense<0.000000e+00> : vector<8x256xf32>
    %5 = tpu.matmul %3, %4, %cst_5 {dimension_numbers = #tpu.dot_dimension_numbers<[1], [0], [0], [1], [0, 0, 1, 1], [], []>} : vector<8x3xf32>, vector<3x256xf32>, vector<8x256xf32> -> vector<8x256xf32>
    %c0_6 = arith.constant 0 : index
    %c0_7 = arith.constant 0 : index
    %6 = vector.load %arg4[%c0_6, %c0_7] : memref<1x256xf32, #tpu.memory_space<vmem>>, vector<1x256xf32>
    %7 = vector.broadcast %6 : vector<1x256xf32> to vector<8x256xf32>
    %8 = arith.addf %5, %7 : vector<8x256xf32>
    %cst_8 = arith.constant 0.000000e+00 : f32
    %9 = vector.broadcast %cst_8 : f32 to vector<8x256xf32>
    %10 = arith.maximumf %8, %9 : vector<8x256xf32>
    %11 = arith.truncf %10 : vector<8x256xf32> to vector<8x256xbf16>
    %c0_9 = arith.constant 0 : index
    %c0_10 = arith.constant 0 : index
    %12 = vector.load %arg5[%c0_9, %c0_10] : memref<256x128xbf16, #tpu.memory_space<vmem>>, vector<256x128xbf16>
    %cst_11 = arith.constant dense<0.000000e+00> : vector<8x128xf32>
    %13 = tpu.matmul %11, %12, %cst_11 {dimension_numbers = #tpu.dot_dimension_numbers<[1], [0], [0], [1], [0, 0, 1, 1], [], []>} : vector<8x256xbf16>, vector<256x128xbf16>, vector<8x128xf32> -> vector<8x128xf32>
    %c0_12 = arith.constant 0 : index
    %c0_13 = arith.constant 0 : index
    %14 = vector.load %arg6[%c0_12, %c0_13] : memref<1x128xf32, #tpu.memory_space<vmem>>, vector<1x128xf32>
    %15 = vector.broadcast %14 : vector<1x128xf32> to vector<8x128xf32>
    %16 = arith.addf %13, %15 : vector<8x128xf32>
    %c0_14 = arith.constant 0 : index
    %c0_15 = arith.constant 0 : index
    %17 = vector.load %arg7[%c0_14, %c0_15] : memref<256x128xbf16, #tpu.memory_space<vmem>>, vector<256x128xbf16>
    %cst_16 = arith.constant dense<0.000000e+00> : vector<8x128xf32>
    %18 = tpu.matmul %11, %17, %cst_16 {dimension_numbers = #tpu.dot_dimension_numbers<[1], [0], [0], [1], [0, 0, 1, 1], [], []>} : vector<8x256xbf16>, vector<256x128xbf16>, vector<8x128xf32> -> vector<8x128xf32>
    %c0_17 = arith.constant 0 : index
    %c0_18 = arith.constant 0 : index
    %19 = vector.load %arg8[%c0_17, %c0_18] : memref<1x128xf32, #tpu.memory_space<vmem>>, vector<1x128xf32>
    %20 = vector.broadcast %19 : vector<1x128xf32> to vector<8x128xf32>
    %21 = arith.addf %18, %20 : vector<8x128xf32>
    %c0_19 = arith.constant 0 : index
    %c0_20 = arith.constant 0 : index
    %22 = vector.load %arg2[%c0_19, %c0_20] : memref<56x128xbf16, #tpu.memory_space<vmem>>, vector<56x128xbf16>
    %c0_21 = arith.constant 0 : index
    %c0_22 = arith.constant 0 : index
    %23 = vector.load %arg9[%c0_21, %c0_22] : memref<128x512xbf16, #tpu.memory_space<vmem>>, vector<128x512xbf16>
    %cst_23 = arith.constant dense<0.000000e+00> : vector<56x512xf32>
    %24 = tpu.matmul %22, %23, %cst_23 {dimension_numbers = #tpu.dot_dimension_numbers<[1], [0], [0], [1], [0, 0, 1, 1], [], []>} : vector<56x128xbf16>, vector<128x512xbf16>, vector<56x512xf32> -> vector<56x512xf32>
    %c0_24 = arith.constant 0 : index
    %c0_25 = arith.constant 0 : index
    %25 = vector.load %arg10[%c0_24, %c0_25] : memref<1x512xf32, #tpu.memory_space<vmem>>, vector<1x512xf32>
    %26 = vector.broadcast %25 : vector<1x512xf32> to vector<56x512xf32>
    %27 = arith.addf %24, %26 : vector<56x512xf32>
    %c0_26 = arith.constant 0 : index
    %c0_27 = arith.constant 0 : index
    %28 = vector.load %arg17[%c0_26, %c0_27] : memref<56x512xf32, #tpu.memory_space<vmem>>, vector<56x512xf32>
    tpu.vector_store %arg17[%c0_26, %c0_27], %27 {strides = array<i32>} : memref<56x512xf32, #tpu.memory_space<vmem>>, vector<56x512xf32>,
    %c0_i32 = arith.constant 0 : i32
    %c8_i32 = arith.constant 8 : i32
    %29 = arith.muli %c0_i32, %c8_i32 : i32
    %30 = tpu.assume_multiple %29, 8 : i32
    %31 = arith.index_cast %30 : i32 to index
    %c0_28 = arith.constant 0 : index
    %32 = vector.load %arg17[%31, %c0_28] : memref<56x512xf32, #tpu.memory_space<vmem>>, vector<8x512xf32>
    %33 = arith.truncf %16 : vector<8x128xf32> to vector<8x128xbf16>
    %c0_29 = arith.constant 0 : index
    %c0_30 = arith.constant 0 : index
    %34 = vector.load %arg11[%c0_29, %c0_30] : memref<128x512xbf16, #tpu.memory_space<vmem>>, vector<128x512xbf16>
    %cst_31 = arith.constant dense<0.000000e+00> : vector<8x512xf32>
    %35 = tpu.matmul %33, %34, %cst_31 {dimension_numbers = #tpu.dot_dimension_numbers<[1], [0], [0], [1], [0, 0, 1, 1], [], []>} : vector<8x128xbf16>, vector<128x512xbf16>, vector<8x512xf32> -> vector<8x512xf32>
    %36 = arith.addf %32, %35 : vector<8x512xf32>
    %c0_32 = arith.constant 0 : index
    %c0_33 = arith.constant 0 : index
    %37 = vector.load %arg12[%c0_32, %c0_33] : memref<1x512xf32, #tpu.memory_space<vmem>>, vector<1x512xf32>
    %38 = vector.broadcast %37 : vector<1x512xf32> to vector<8x512xf32>
    %39 = arith.addf %36, %38 : vector<8x512xf32>
    %40 = vector.extract_strided_slice %39 {offsets = [0, 0], sizes = [8, 128], strides = [1, 1]} : vector<8x512xf32> to vector<8x128xf32>
    %41 = arith.negf %40 : vector<8x128xf32>
    %42 = math.exp %41 : vector<8x128xf32>
    %cst_34 = arith.constant 1.000000e+00 : f32
    %43 = vector.broadcast %cst_34 : f32 to vector<8x128xf32>
    %44 = arith.addf %43, %42 : vector<8x128xf32>
    %45 = arith.divf %43, %44 : vector<8x128xf32>
    %46 = vector.extract_strided_slice %39 {offsets = [0, 128], sizes = [8, 128], strides = [1, 1]} : vector<8x512xf32> to vector<8x128xf32>
    %47 = arith.negf %46 : vector<8x128xf32>
    %48 = math.exp %47 : vector<8x128xf32>
    %cst_35 = arith.constant 1.000000e+00 : f32
    %49 = vector.broadcast %cst_35 : f32 to vector<8x128xf32>
    %50 = arith.addf %49, %48 : vector<8x128xf32>
    %51 = arith.divf %49, %50 : vector<8x128xf32>
    %52 = vector.extract_strided_slice %39 {offsets = [0, 256], sizes = [8, 128], strides = [1, 1]} : vector<8x512xf32> to vector<8x128xf32>
    %53 = math.tanh %52 : vector<8x128xf32>
    %54 = vector.extract_strided_slice %39 {offsets = [0, 384], sizes = [8, 128], strides = [1, 1]} : vector<8x512xf32> to vector<8x128xf32>
    %55 = arith.negf %54 : vector<8x128xf32>
    %56 = math.exp %55 : vector<8x128xf32>
    %cst_36 = arith.constant 1.000000e+00 : f32
    %57 = vector.broadcast %cst_36 : f32 to vector<8x128xf32>
    %58 = arith.addf %57, %56 : vector<8x128xf32>
    %59 = arith.divf %57, %58 : vector<8x128xf32>
    %60 = arith.mulf %51, %21 : vector<8x128xf32>
    %61 = arith.mulf %45, %53 : vector<8x128xf32>
    %62 = arith.addf %60, %61 : vector<8x128xf32>
    %63 = math.tanh %62 : vector<8x128xf32>
    %64 = arith.mulf %59, %63 : vector<8x128xf32>
    %65 = arith.index_cast %30 : i32 to index
    %c0_37 = arith.constant 0 : index
    %66 = vector.load %arg16[%65, %c0_37] : memref<56x128xf32, #tpu.memory_space<vmem>>, vector<8x128xf32>
    tpu.vector_store %arg16[%65, %c0_37], %64 {strides = array<i32>} : memref<56x128xf32, #tpu.memory_space<vmem>>, vector<8x128xf32>,
    %c1_i32 = arith.constant 1 : i32
    %c8_i32_38 = arith.constant 8 : i32
    %67 = arith.muli %c1_i32, %c8_i32_38 : i32
    %68 = tpu.assume_multiple %67, 8 : i32
    %69 = arith.index_cast %68 : i32 to index
    %c0_39 = arith.constant 0 : index
    %70 = vector.load %arg17[%69, %c0_39] : memref<56x512xf32, #tpu.memory_space<vmem>>, vector<8x512xf32>
    %71 = arith.truncf %64 : vector<8x128xf32> to vector<8x128xbf16>
    %c0_40 = arith.constant 0 : index
    %c0_41 = arith.constant 0 : index
    %72 = vector.load %arg11[%c0_40, %c0_41] : memref<128x512xbf16, #tpu.memory_space<vmem>>, vector<128x512xbf16>
    %cst_42 = arith.constant dense<0.000000e+00> : vector<8x512xf32>
    %73 = tpu.matmul %71, %72, %cst_42 {dimension_numbers = #tpu.dot_dimension_numbers<[1], [0], [0], [1], [0, 0, 1, 1], [], []>} : vector<8x128xbf16>, vector<128x512xbf16>, vector<8x512xf32> -> vector<8x512xf32>
    %74 = arith.addf %70, %73 : vector<8x512xf32>
    %c0_43 = arith.constant 0 : index
    %c0_44 = arith.constant 0 : index
    %75 = vector.load %arg12[%c0_43, %c0_44] : memref<1x512xf32, #tpu.memory_space<vmem>>, vector<1x512xf32>
    %76 = vector.broadcast %75 : vector<1x512xf32> to vector<8x512xf32>
    %77 = arith.addf %74, %76 : vector<8x512xf32>
    %78 = vector.extract_strided_slice %77 {offsets = [0, 0], sizes = [8, 128], strides = [1, 1]} : vector<8x512xf32> to vector<8x128xf32>
    %79 = arith.negf %78 : vector<8x128xf32>
    %80 = math.exp %79 : vector<8x128xf32>
    %cst_45 = arith.constant 1.000000e+00 : f32
    %81 = vector.broadcast %cst_45 : f32 to vector<8x128xf32>
    %82 = arith.addf %81, %80 : vector<8x128xf32>
    %83 = arith.divf %81, %82 : vector<8x128xf32>
    %84 = vector.extract_strided_slice %77 {offsets = [0, 128], sizes = [8, 128], strides = [1, 1]} : vector<8x512xf32> to vector<8x128xf32>
    %85 = arith.negf %84 : vector<8x128xf32>
    %86 = math.exp %85 : vector<8x128xf32>
    %cst_46 = arith.constant 1.000000e+00 : f32
    %87 = vector.broadcast %cst_46 : f32 to vector<8x128xf32>
    %88 = arith.addf %87, %86 : vector<8x128xf32>
    %89 = arith.divf %87, %88 : vector<8x128xf32>
    %90 = vector.extract_strided_slice %77 {offsets = [0, 256], sizes = [8, 128], strides = [1, 1]} : vector<8x512xf32> to vector<8x128xf32>
    %91 = math.tanh %90 : vector<8x128xf32>
    %92 = vector.extract_strided_slice %77 {offsets = [0, 384], sizes = [8, 128], strides = [1, 1]} : vector<8x512xf32> to vector<8x128xf32>
    %93 = arith.negf %92 : vector<8x128xf32>
    %94 = math.exp %93 : vector<8x128xf32>
    %cst_47 = arith.constant 1.000000e+00 : f32
    %95 = vector.broadcast %cst_47 : f32 to vector<8x128xf32>
    %96 = arith.addf %95, %94 : vector<8x128xf32>
    %97 = arith.divf %95, %96 : vector<8x128xf32>
    %98 = arith.mulf %89, %62 : vector<8x128xf32>
    %99 = arith.mulf %83, %91 : vector<8x128xf32>
    %100 = arith.addf %98, %99 : vector<8x128xf32>
    %101 = math.tanh %100 : vector<8x128xf32>
    %102 = arith.mulf %97, %101 : vector<8x128xf32>
    %103 = arith.index_cast %68 : i32 to index
    %c0_48 = arith.constant 0 : index
    %104 = vector.load %arg16[%103, %c0_48] : memref<56x128xf32, #tpu.memory_space<vmem>>, vector<8x128xf32>
    tpu.vector_store %arg16[%103, %c0_48], %102 {strides = array<i32>} : memref<56x128xf32, #tpu.memory_space<vmem>>, vector<8x128xf32>,
    %c2_i32 = arith.constant 2 : i32
    %c8_i32_49 = arith.constant 8 : i32
    %105 = arith.muli %c2_i32, %c8_i32_49 : i32
    %106 = tpu.assume_multiple %105, 8 : i32
    %107 = arith.index_cast %106 : i32 to index
    %c0_50 = arith.constant 0 : index
    %108 = vector.load %arg17[%107, %c0_50] : memref<56x512xf32, #tpu.memory_space<vmem>>, vector<8x512xf32>
    %109 = arith.truncf %102 : vector<8x128xf32> to vector<8x128xbf16>
    %c0_51 = arith.constant 0 : index
    %c0_52 = arith.constant 0 : index
    %110 = vector.load %arg11[%c0_51, %c0_52] : memref<128x512xbf16, #tpu.memory_space<vmem>>, vector<128x512xbf16>
    %cst_53 = arith.constant dense<0.000000e+00> : vector<8x512xf32>
    %111 = tpu.matmul %109, %110, %cst_53 {dimension_numbers = #tpu.dot_dimension_numbers<[1], [0], [0], [1], [0, 0, 1, 1], [], []>} : vector<8x128xbf16>, vector<128x512xbf16>, vector<8x512xf32> -> vector<8x512xf32>
    %112 = arith.addf %108, %111 : vector<8x512xf32>
    %c0_54 = arith.constant 0 : index
    %c0_55 = arith.constant 0 : index
    %113 = vector.load %arg12[%c0_54, %c0_55] : memref<1x512xf32, #tpu.memory_space<vmem>>, vector<1x512xf32>
    %114 = vector.broadcast %113 : vector<1x512xf32> to vector<8x512xf32>
    %115 = arith.addf %112, %114 : vector<8x512xf32>
    %116 = vector.extract_strided_slice %115 {offsets = [0, 0], sizes = [8, 128], strides = [1, 1]} : vector<8x512xf32> to vector<8x128xf32>
    %117 = arith.negf %116 : vector<8x128xf32>
    %118 = math.exp %117 : vector<8x128xf32>
    %cst_56 = arith.constant 1.000000e+00 : f32
    %119 = vector.broadcast %cst_56 : f32 to vector<8x128xf32>
    %120 = arith.addf %119, %118 : vector<8x128xf32>
    %121 = arith.divf %119, %120 : vector<8x128xf32>
    %122 = vector.extract_strided_slice %115 {offsets = [0, 128], sizes = [8, 128], strides = [1, 1]} : vector<8x512xf32> to vector<8x128xf32>
    %123 = arith.negf %122 : vector<8x128xf32>
    %124 = math.exp %123 : vector<8x128xf32>
    %cst_57 = arith.constant 1.000000e+00 : f32
    %125 = vector.broadcast %cst_57 : f32 to vector<8x128xf32>
    %126 = arith.addf %125, %124 : vector<8x128xf32>
    %127 = arith.divf %125, %126 : vector<8x128xf32>
    %128 = vector.extract_strided_slice %115 {offsets = [0, 256], sizes = [8, 128], strides = [1, 1]} : vector<8x512xf32> to vector<8x128xf32>
    %129 = math.tanh %128 : vector<8x128xf32>
    %130 = vector.extract_strided_slice %115 {offsets = [0, 384], sizes = [8, 128], strides = [1, 1]} : vector<8x512xf32> to vector<8x128xf32>
    %131 = arith.negf %130 : vector<8x128xf32>
    %132 = math.exp %131 : vector<8x128xf32>
    %cst_58 = arith.constant 1.000000e+00 : f32
    %133 = vector.broadcast %cst_58 : f32 to vector<8x128xf32>
    %134 = arith.addf %133, %132 : vector<8x128xf32>
    %135 = arith.divf %133, %134 : vector<8x128xf32>
    %136 = arith.mulf %127, %100 : vector<8x128xf32>
    %137 = arith.mulf %121, %129 : vector<8x128xf32>
    %138 = arith.addf %136, %137 : vector<8x128xf32>
    %139 = math.tanh %138 : vector<8x128xf32>
    %140 = arith.mulf %135, %139 : vector<8x128xf32>
    %141 = arith.index_cast %106 : i32 to index
    %c0_59 = arith.constant 0 : index
    %142 = vector.load %arg16[%141, %c0_59] : memref<56x128xf32, #tpu.memory_space<vmem>>, vector<8x128xf32>
    tpu.vector_store %arg16[%141, %c0_59], %140 {strides = array<i32>} : memref<56x128xf32, #tpu.memory_space<vmem>>, vector<8x128xf32>,
    %c3_i32 = arith.constant 3 : i32
    %c8_i32_60 = arith.constant 8 : i32
    %143 = arith.muli %c3_i32, %c8_i32_60 : i32
    %144 = tpu.assume_multiple %143, 8 : i32
    %145 = arith.index_cast %144 : i32 to index
    %c0_61 = arith.constant 0 : index
    %146 = vector.load %arg17[%145, %c0_61] : memref<56x512xf32, #tpu.memory_space<vmem>>, vector<8x512xf32>
    %147 = arith.truncf %140 : vector<8x128xf32> to vector<8x128xbf16>
    %c0_62 = arith.constant 0 : index
    %c0_63 = arith.constant 0 : index
    %148 = vector.load %arg11[%c0_62, %c0_63] : memref<128x512xbf16, #tpu.memory_space<vmem>>, vector<128x512xbf16>
    %cst_64 = arith.constant dense<0.000000e+00> : vector<8x512xf32>
    %149 = tpu.matmul %147, %148, %cst_64 {dimension_numbers = #tpu.dot_dimension_numbers<[1], [0], [0], [1], [0, 0, 1, 1], [], []>} : vector<8x128xbf16>, vector<128x512xbf16>, vector<8x512xf32> -> vector<8x512xf32>
    %150 = arith.addf %146, %149 : vector<8x512xf32>
    %c0_65 = arith.constant 0 : index
    %c0_66 = arith.constant 0 : index
    %151 = vector.load %arg12[%c0_65, %c0_66] : memref<1x512xf32, #tpu.memory_space<vmem>>, vector<1x512xf32>
    %152 = vector.broadcast %151 : vector<1x512xf32> to vector<8x512xf32>
    %153 = arith.addf %150, %152 : vector<8x512xf32>
    %154 = vector.extract_strided_slice %153 {offsets = [0, 0], sizes = [8, 128], strides = [1, 1]} : vector<8x512xf32> to vector<8x128xf32>
    %155 = arith.negf %154 : vector<8x128xf32>
    %156 = math.exp %155 : vector<8x128xf32>
    %cst_67 = arith.constant 1.000000e+00 : f32
    %157 = vector.broadcast %cst_67 : f32 to vector<8x128xf32>
    %158 = arith.addf %157, %156 : vector<8x128xf32>
    %159 = arith.divf %157, %158 : vector<8x128xf32>
    %160 = vector.extract_strided_slice %153 {offsets = [0, 128], sizes = [8, 128], strides = [1, 1]} : vector<8x512xf32> to vector<8x128xf32>
    %161 = arith.negf %160 : vector<8x128xf32>
    %162 = math.exp %161 : vector<8x128xf32>
    %cst_68 = arith.constant 1.000000e+00 : f32
    %163 = vector.broadcast %cst_68 : f32 to vector<8x128xf32>
    %164 = arith.addf %163, %162 : vector<8x128xf32>
    %165 = arith.divf %163, %164 : vector<8x128xf32>
    %166 = vector.extract_strided_slice %153 {offsets = [0, 256], sizes = [8, 128], strides = [1, 1]} : vector<8x512xf32> to vector<8x128xf32>
    %167 = math.tanh %166 : vector<8x128xf32>
    %168 = vector.extract_strided_slice %153 {offsets = [0, 384], sizes = [8, 128], strides = [1, 1]} : vector<8x512xf32> to vector<8x128xf32>
    %169 = arith.negf %168 : vector<8x128xf32>
    %170 = math.exp %169 : vector<8x128xf32>
    %cst_69 = arith.constant 1.000000e+00 : f32
    %171 = vector.broadcast %cst_69 : f32 to vector<8x128xf32>
    %172 = arith.addf %171, %170 : vector<8x128xf32>
    %173 = arith.divf %171, %172 : vector<8x128xf32>
    %174 = arith.mulf %165, %138 : vector<8x128xf32>
    %175 = arith.mulf %159, %167 : vector<8x128xf32>
    %176 = arith.addf %174, %175 : vector<8x128xf32>
    %177 = math.tanh %176 : vector<8x128xf32>
    %178 = arith.mulf %173, %177 : vector<8x128xf32>
    %179 = arith.index_cast %144 : i32 to index
    %c0_70 = arith.constant 0 : index
    %180 = vector.load %arg16[%179, %c0_70] : memref<56x128xf32, #tpu.memory_space<vmem>>, vector<8x128xf32>
    tpu.vector_store %arg16[%179, %c0_70], %178 {strides = array<i32>} : memref<56x128xf32, #tpu.memory_space<vmem>>, vector<8x128xf32>,
    %c4_i32 = arith.constant 4 : i32
    %c8_i32_71 = arith.constant 8 : i32
    %181 = arith.muli %c4_i32, %c8_i32_71 : i32
    %182 = tpu.assume_multiple %181, 8 : i32
    %183 = arith.index_cast %182 : i32 to index
    %c0_72 = arith.constant 0 : index
    %184 = vector.load %arg17[%183, %c0_72] : memref<56x512xf32, #tpu.memory_space<vmem>>, vector<8x512xf32>
    %185 = arith.truncf %178 : vector<8x128xf32> to vector<8x128xbf16>
    %c0_73 = arith.constant 0 : index
    %c0_74 = arith.constant 0 : index
    %186 = vector.load %arg11[%c0_73, %c0_74] : memref<128x512xbf16, #tpu.memory_space<vmem>>, vector<128x512xbf16>
    %cst_75 = arith.constant dense<0.000000e+00> : vector<8x512xf32>
    %187 = tpu.matmul %185, %186, %cst_75 {dimension_numbers = #tpu.dot_dimension_numbers<[1], [0], [0], [1], [0, 0, 1, 1], [], []>} : vector<8x128xbf16>, vector<128x512xbf16>, vector<8x512xf32> -> vector<8x512xf32>
    %188 = arith.addf %184, %187 : vector<8x512xf32>
    %c0_76 = arith.constant 0 : index
    %c0_77 = arith.constant 0 : index
    %189 = vector.load %arg12[%c0_76, %c0_77] : memref<1x512xf32, #tpu.memory_space<vmem>>, vector<1x512xf32>
    %190 = vector.broadcast %189 : vector<1x512xf32> to vector<8x512xf32>
    %191 = arith.addf %188, %190 : vector<8x512xf32>
    %192 = vector.extract_strided_slice %191 {offsets = [0, 0], sizes = [8, 128], strides = [1, 1]} : vector<8x512xf32> to vector<8x128xf32>
    %193 = arith.negf %192 : vector<8x128xf32>
    %194 = math.exp %193 : vector<8x128xf32>
    %cst_78 = arith.constant 1.000000e+00 : f32
    %195 = vector.broadcast %cst_78 : f32 to vector<8x128xf32>
    %196 = arith.addf %195, %194 : vector<8x128xf32>
    %197 = arith.divf %195, %196 : vector<8x128xf32>
    %198 = vector.extract_strided_slice %191 {offsets = [0, 128], sizes = [8, 128], strides = [1, 1]} : vector<8x512xf32> to vector<8x128xf32>
    %199 = arith.negf %198 : vector<8x128xf32>
    %200 = math.exp %199 : vector<8x128xf32>
    %cst_79 = arith.constant 1.000000e+00 : f32
    %201 = vector.broadcast %cst_79 : f32 to vector<8x128xf32>
    %202 = arith.addf %201, %200 : vector<8x128xf32>
    %203 = arith.divf %201, %202 : vector<8x128xf32>
    %204 = vector.extract_strided_slice %191 {offsets = [0, 256], sizes = [8, 128], strides = [1, 1]} : vector<8x512xf32> to vector<8x128xf32>
    %205 = math.tanh %204 : vector<8x128xf32>
    %206 = vector.extract_strided_slice %191 {offsets = [0, 384], sizes = [8, 128], strides = [1, 1]} : vector<8x512xf32> to vector<8x128xf32>
    %207 = arith.negf %206 : vector<8x128xf32>
    %208 = math.exp %207 : vector<8x128xf32>
    %cst_80 = arith.constant 1.000000e+00 : f32
    %209 = vector.broadcast %cst_80 : f32 to vector<8x128xf32>
    %210 = arith.addf %209, %208 : vector<8x128xf32>
    %211 = arith.divf %209, %210 : vector<8x128xf32>
    %212 = arith.mulf %203, %176 : vector<8x128xf32>
    %213 = arith.mulf %197, %205 : vector<8x128xf32>
    %214 = arith.addf %212, %213 : vector<8x128xf32>
    %215 = math.tanh %214 : vector<8x128xf32>
    %216 = arith.mulf %211, %215 : vector<8x128xf32>
    %217 = arith.index_cast %182 : i32 to index
    %c0_81 = arith.constant 0 : index
    %218 = vector.load %arg16[%217, %c0_81] : memref<56x128xf32, #tpu.memory_space<vmem>>, vector<8x128xf32>
    tpu.vector_store %arg16[%217, %c0_81], %216 {strides = array<i32>} : memref<56x128xf32, #tpu.memory_space<vmem>>, vector<8x128xf32>,
    %c5_i32 = arith.constant 5 : i32
    %c8_i32_82 = arith.constant 8 : i32
    %219 = arith.muli %c5_i32, %c8_i32_82 : i32
    %220 = tpu.assume_multiple %219, 8 : i32
    %221 = arith.index_cast %220 : i32 to index
    %c0_83 = arith.constant 0 : index
    %222 = vector.load %arg17[%221, %c0_83] : memref<56x512xf32, #tpu.memory_space<vmem>>, vector<8x512xf32>
    %223 = arith.truncf %216 : vector<8x128xf32> to vector<8x128xbf16>
    %c0_84 = arith.constant 0 : index
    %c0_85 = arith.constant 0 : index
    %224 = vector.load %arg11[%c0_84, %c0_85] : memref<128x512xbf16, #tpu.memory_space<vmem>>, vector<128x512xbf16>
    %cst_86 = arith.constant dense<0.000000e+00> : vector<8x512xf32>
    %225 = tpu.matmul %223, %224, %cst_86 {dimension_numbers = #tpu.dot_dimension_numbers<[1], [0], [0], [1], [0, 0, 1, 1], [], []>} : vector<8x128xbf16>, vector<128x512xbf16>, vector<8x512xf32> -> vector<8x512xf32>
    %226 = arith.addf %222, %225 : vector<8x512xf32>
    %c0_87 = arith.constant 0 : index
    %c0_88 = arith.constant 0 : index
    %227 = vector.load %arg12[%c0_87, %c0_88] : memref<1x512xf32, #tpu.memory_space<vmem>>, vector<1x512xf32>
    %228 = vector.broadcast %227 : vector<1x512xf32> to vector<8x512xf32>
    %229 = arith.addf %226, %228 : vector<8x512xf32>
    %230 = vector.extract_strided_slice %229 {offsets = [0, 0], sizes = [8, 128], strides = [1, 1]} : vector<8x512xf32> to vector<8x128xf32>
    %231 = arith.negf %230 : vector<8x128xf32>
    %232 = math.exp %231 : vector<8x128xf32>
    %cst_89 = arith.constant 1.000000e+00 : f32
    %233 = vector.broadcast %cst_89 : f32 to vector<8x128xf32>
    %234 = arith.addf %233, %232 : vector<8x128xf32>
    %235 = arith.divf %233, %234 : vector<8x128xf32>
    %236 = vector.extract_strided_slice %229 {offsets = [0, 128], sizes = [8, 128], strides = [1, 1]} : vector<8x512xf32> to vector<8x128xf32>
    %237 = arith.negf %236 : vector<8x128xf32>
    %238 = math.exp %237 : vector<8x128xf32>
    %cst_90 = arith.constant 1.000000e+00 : f32
    %239 = vector.broadcast %cst_90 : f32 to vector<8x128xf32>
    %240 = arith.addf %239, %238 : vector<8x128xf32>
    %241 = arith.divf %239, %240 : vector<8x128xf32>
    %242 = vector.extract_strided_slice %229 {offsets = [0, 256], sizes = [8, 128], strides = [1, 1]} : vector<8x512xf32> to vector<8x128xf32>
    %243 = math.tanh %242 : vector<8x128xf32>
    %244 = vector.extract_strided_slice %229 {offsets = [0, 384], sizes = [8, 128], strides = [1, 1]} : vector<8x512xf32> to vector<8x128xf32>
    %245 = arith.negf %244 : vector<8x128xf32>
    %246 = math.exp %245 : vector<8x128xf32>
    %cst_91 = arith.constant 1.000000e+00 : f32
    %247 = vector.broadcast %cst_91 : f32 to vector<8x128xf32>
    %248 = arith.addf %247, %246 : vector<8x128xf32>
    %249 = arith.divf %247, %248 : vector<8x128xf32>
    %250 = arith.mulf %241, %214 : vector<8x128xf32>
    %251 = arith.mulf %235, %243 : vector<8x128xf32>
    %252 = arith.addf %250, %251 : vector<8x128xf32>
    %253 = math.tanh %252 : vector<8x128xf32>
    %254 = arith.mulf %249, %253 : vector<8x128xf32>
    %255 = arith.index_cast %220 : i32 to index
    %c0_92 = arith.constant 0 : index
    %256 = vector.load %arg16[%255, %c0_92] : memref<56x128xf32, #tpu.memory_space<vmem>>, vector<8x128xf32>
    tpu.vector_store %arg16[%255, %c0_92], %254 {strides = array<i32>} : memref<56x128xf32, #tpu.memory_space<vmem>>, vector<8x128xf32>,
    %c6_i32 = arith.constant 6 : i32
    %c8_i32_93 = arith.constant 8 : i32
    %257 = arith.muli %c6_i32, %c8_i32_93 : i32
    %258 = tpu.assume_multiple %257, 8 : i32
    %259 = arith.index_cast %258 : i32 to index
    %c0_94 = arith.constant 0 : index
    %260 = vector.load %arg17[%259, %c0_94] : memref<56x512xf32, #tpu.memory_space<vmem>>, vector<8x512xf32>
    %261 = arith.truncf %254 : vector<8x128xf32> to vector<8x128xbf16>
    %c0_95 = arith.constant 0 : index
    %c0_96 = arith.constant 0 : index
    %262 = vector.load %arg11[%c0_95, %c0_96] : memref<128x512xbf16, #tpu.memory_space<vmem>>, vector<128x512xbf16>
    %cst_97 = arith.constant dense<0.000000e+00> : vector<8x512xf32>
    %263 = tpu.matmul %261, %262, %cst_97 {dimension_numbers = #tpu.dot_dimension_numbers<[1], [0], [0], [1], [0, 0, 1, 1], [], []>} : vector<8x128xbf16>, vector<128x512xbf16>, vector<8x512xf32> -> vector<8x512xf32>
    %264 = arith.addf %260, %263 : vector<8x512xf32>
    %c0_98 = arith.constant 0 : index
    %c0_99 = arith.constant 0 : index
    %265 = vector.load %arg12[%c0_98, %c0_99] : memref<1x512xf32, #tpu.memory_space<vmem>>, vector<1x512xf32>
    %266 = vector.broadcast %265 : vector<1x512xf32> to vector<8x512xf32>
    %267 = arith.addf %264, %266 : vector<8x512xf32>
    %268 = vector.extract_strided_slice %267 {offsets = [0, 0], sizes = [8, 128], strides = [1, 1]} : vector<8x512xf32> to vector<8x128xf32>
    %269 = arith.negf %268 : vector<8x128xf32>
    %270 = math.exp %269 : vector<8x128xf32>
    %cst_100 = arith.constant 1.000000e+00 : f32
    %271 = vector.broadcast %cst_100 : f32 to vector<8x128xf32>
    %272 = arith.addf %271, %270 : vector<8x128xf32>
    %273 = arith.divf %271, %272 : vector<8x128xf32>
    %274 = vector.extract_strided_slice %267 {offsets = [0, 128], sizes = [8, 128], strides = [1, 1]} : vector<8x512xf32> to vector<8x128xf32>
    %275 = arith.negf %274 : vector<8x128xf32>
    %276 = math.exp %275 : vector<8x128xf32>
    %cst_101 = arith.constant 1.000000e+00 : f32
    %277 = vector.broadcast %cst_101 : f32 to vector<8x128xf32>
    %278 = arith.addf %277, %276 : vector<8x128xf32>
    %279 = arith.divf %277, %278 : vector<8x128xf32>
    %280 = vector.extract_strided_slice %267 {offsets = [0, 256], sizes = [8, 128], strides = [1, 1]} : vector<8x512xf32> to vector<8x128xf32>
    %281 = math.tanh %280 : vector<8x128xf32>
    %282 = vector.extract_strided_slice %267 {offsets = [0, 384], sizes = [8, 128], strides = [1, 1]} : vector<8x512xf32> to vector<8x128xf32>
    %283 = arith.negf %282 : vector<8x128xf32>
    %284 = math.exp %283 : vector<8x128xf32>
    %cst_102 = arith.constant 1.000000e+00 : f32
    %285 = vector.broadcast %cst_102 : f32 to vector<8x128xf32>
    %286 = arith.addf %285, %284 : vector<8x128xf32>
    %287 = arith.divf %285, %286 : vector<8x128xf32>
    %288 = arith.mulf %279, %252 : vector<8x128xf32>
    %289 = arith.mulf %273, %281 : vector<8x128xf32>
    %290 = arith.addf %288, %289 : vector<8x128xf32>
    %291 = math.tanh %290 : vector<8x128xf32>
    %292 = arith.mulf %287, %291 : vector<8x128xf32>
    %293 = arith.index_cast %258 : i32 to index
    %c0_103 = arith.constant 0 : index
    %294 = vector.load %arg16[%293, %c0_103] : memref<56x128xf32, #tpu.memory_space<vmem>>, vector<8x128xf32>
    tpu.vector_store %arg16[%293, %c0_103], %292 {strides = array<i32>} : memref<56x128xf32, #tpu.memory_space<vmem>>, vector<8x128xf32>,
    %c7_i32 = arith.constant 7 : i32
    %c0_104 = arith.constant 0 : index
    %c0_105 = arith.constant 0 : index
    %295 = vector.load %arg16[%c0_104, %c0_105] : memref<56x128xf32, #tpu.memory_space<vmem>>, vector<56x128xf32>
    %296 = arith.truncf %295 : vector<56x128xf32> to vector<56x128xbf16>
    %c0_106 = arith.constant 0 : index
    %c0_107 = arith.constant 0 : index
    %297 = vector.load %arg13[%c0_106, %c0_107] : memref<128x128xbf16, #tpu.memory_space<vmem>>, vector<128x128xbf16>
    %cst_108 = arith.constant dense<0.000000e+00> : vector<56x128xf32>
    %298 = tpu.matmul %296, %297, %cst_108 {dimension_numbers = #tpu.dot_dimension_numbers<[1], [0], [0], [1], [0, 0, 1, 1], [], []>} : vector<56x128xbf16>, vector<128x128xbf16>, vector<56x128xf32> -> vector<56x128xf32>
    %c0_109 = arith.constant 0 : index
    %c0_110 = arith.constant 0 : index
    %299 = vector.load %arg14[%c0_109, %c0_110] : memref<1x128xf32, #tpu.memory_space<vmem>>, vector<1x128xf32>
    %300 = vector.broadcast %299 : vector<1x128xf32> to vector<56x128xf32>
    %301 = arith.addf %298, %300 : vector<56x128xf32>
    %c0_111 = arith.constant 0 : index
    %c0_112 = arith.constant 0 : index
    %302 = vector.load %arg15[%c0_111, %c0_112] : memref<56x128xf32, #tpu.memory_space<vmem>>, vector<56x128xf32>
    tpu.vector_store %arg15[%c0_111, %c0_112], %301 {strides = array<i32>} : memref<56x128xf32, #tpu.memory_space<vmem>>, vector<56x128xf32>,
    return
  }
  func.func @transform_0(%arg0: i32) -> (i32, i32, i32) {
    %c0_i32 = arith.constant 0 : i32
    %c0_i32_0 = arith.constant 0 : i32
    %c0_i32_1 = arith.constant 0 : i32
    %c0_i32_2 = arith.constant 0 : i32
    return %c0_i32, %c0_i32_0, %c0_i32_1 : i32, i32, i32
  }
  func.func @transform_1(%arg0: i32) -> (i32, i32) {
    %c0_i32 = arith.constant 0 : i32
    %c0_i32_0 = arith.constant 0 : i32
    %c0_i32_1 = arith.constant 0 : i32
    return %c0_i32, %c0_i32_0 : i32, i32
  }
  func.func @transform_2(%arg0: i32) -> (i32, i32) {
    %c0_i32 = arith.constant 0 : i32
    %c0_i32_0 = arith.constant 0 : i32
    %c0_i32_1 = arith.constant 0 : i32
    return %c0_i32, %c0_i32_0 : i32, i32
  }
  func.func @transform_3(%arg0: i32) -> (i32, i32) {
    %c0_i32 = arith.constant 0 : i32
    %c0_i32_0 = arith.constant 0 : i32
    %c0_i32_1 = arith.constant 0 : i32
    return %c0_i32, %c0_i32_0 : i32, i32
  }
  func.func @transform_4(%arg0: i32) -> (i32, i32) {
    %c0_i32 = arith.constant 0 : i32
    %c0_i32_0 = arith.constant 0 : i32
    %c0_i32_1 = arith.constant 0 : i32
    return %c0_i32, %c0_i32_0 : i32, i32
  }
  func.func @transform_5(%arg0: i32) -> (i32, i32) {
    %c0_i32 = arith.constant 0 : i32
    %c0_i32_0 = arith.constant 0 : i32
    %c0_i32_1 = arith.constant 0 : i32
    return %c0_i32, %c0_i32_0 : i32, i32
  }
  func.func @transform_6(%arg0: i32) -> (i32, i32) {
    %c0_i32 = arith.constant 0 : i32
    %c0_i32_0 = arith.constant 0 : i32
    %c0_i32_1 = arith.constant 0 : i32
    return %c0_i32, %c0_i32_0 : i32, i32
  }
  func.func @transform_7(%arg0: i32) -> (i32, i32) {
    %c0_i32 = arith.constant 0 : i32
    %c0_i32_0 = arith.constant 0 : i32
    %c0_i32_1 = arith.constant 0 : i32
    return %c0_i32, %c0_i32_0 : i32, i32
  }
  func.func @transform_8(%arg0: i32) -> (i32, i32) {
    %c0_i32 = arith.constant 0 : i32
    %c0_i32_0 = arith.constant 0 : i32
    %c0_i32_1 = arith.constant 0 : i32
    return %c0_i32, %c0_i32_0 : i32, i32
  }
  func.func @transform_9(%arg0: i32) -> (i32, i32) {
    %c0_i32 = arith.constant 0 : i32
    %c0_i32_0 = arith.constant 0 : i32
    %c0_i32_1 = arith.constant 0 : i32
    return %c0_i32, %c0_i32_0 : i32, i32
  }
  func.func @transform_10(%arg0: i32) -> (i32, i32) {
    %c0_i32 = arith.constant 0 : i32
    %c0_i32_0 = arith.constant 0 : i32
    %c0_i32_1 = arith.constant 0 : i32
    return %c0_i32, %c0_i32_0 : i32, i32
  }
  func.func @transform_11(%arg0: i32) -> (i32, i32) {
    %c0_i32 = arith.constant 0 : i32
    %c0_i32_0 = arith.constant 0 : i32
    %c0_i32_1 = arith.constant 0 : i32
    return %c0_i32, %c0_i32_0 : i32, i32
  }
  func.func @transform_12(%arg0: i32) -> (i32, i32) {
    %c0_i32 = arith.constant 0 : i32
    %c0_i32_0 = arith.constant 0 : i32
    %c0_i32_1 = arith.constant 0 : i32
    return %c0_i32, %c0_i32_0 : i32, i32
  }
  func.func @transform_13(%arg0: i32) -> (i32, i32) {
    %c0_i32 = arith.constant 0 : i32
    %c0_i32_0 = arith.constant 0 : i32
    %c0_i32_1 = arith.constant 0 : i32
    return %c0_i32, %c0_i32_0 : i32, i32
  }
  func.func @transform_14(%arg0: i32) -> (i32, i32) {
    %c0_i32 = arith.constant 0 : i32
    %c0_i32_0 = arith.constant 0 : i32
    %c0_i32_1 = arith.constant 0 : i32
    return %c0_i32, %c0_i32_0 : i32, i32
  }
}

</mosaic_0001>

<bundles_post_ra>
// kernel: tpu_custom_call.1
= control target key start
LH: loop header
LB: loop body
LE: loop exit
PB: predicated region body
PF: predicated region fallthrough
CT: control target
= control target key end

     0   :  { %19 = vsyncpa [#allocation5], 0  ;;  %s5573_s0 = inlined_call_operand.vmem [shape: f32[8,3,256], index: 0, kind: input, shape index: {}]   ;;  %s5574_s1 = inlined_call_operand.hbm [shape: bf16[56,128], index: 1, kind: input, shape index: {}]   ;;  %s5575_s2 = inlined_call_operand.hbm [shape: f32[3,256], index: 2, kind: input, shape index: {}]   ;;  %s5576_s3 = inlined_call_operand.vmem [shape: f32[1,256], index: 3, kind: input, shape index: {}]   ;;  %s5577_s4 = inlined_call_operand.hbm [shape: bf16[256,128], index: 4, kind: input, shape index: {}]   ;;  %s5578_s5 = inlined_call_operand.hbm [shape: f32[1,128], index: 5, kind: input, shape index: {}]   ;;  %s5579_s6 = inlined_call_operand.vmem [shape: bf16[256,128], index: 6, kind: input, shape index: {}]   ;;  %s5580_s7 = inlined_call_operand.hbm [shape: f32[1,128], index: 7, kind: input, shape index: {}]   ;;  %s5581_s8 = inlined_call_operand.hbm [shape: bf16[128,512], index: 8, kind: input, shape index: {}]   ;;  %s5582_s9 = inlined_call_operand.vmem [shape: f32[1,512], index: 9, kind: input, shape index: {}]   ;;  %s5583_s10 = inlined_call_operand.hbm [shape: bf16[128,512], index: 10, kind: input, shape index: {}]   ;;  %s5584_s11 = inlined_call_operand.vmem [shape: f32[1,512], index: 11, kind: input, shape index: {}]   ;;  %s5585_s12 = inlined_call_operand.hbm [shape: bf16[128,128], index: 12, kind: input, shape index: {}]   ;;  %s5586_s13 = inlined_call_operand.vmem [shape: f32[1,128], index: 13, kind: input, shape index: {}]   ;;  %s5587_s14 = inlined_call_operand.hbm [shape: f32[56,128], index: 14, kind: output, shape index: {}]  }
   0x1   :  { %20 = vsyncpa [#allocation8], 0 }
   0x2   :  { %21 = vsyncpa [#allocation11], 0 }
   0x3   :  { %22 = vsyncpa [#allocation14], 0 }
   0x4   :  { %23 = vsyncpa [#allocation17], 0 }
   0x5   :  { %24 = vsyncpa [#allocation6], 0  ;;  %s4638_s29 = smov [#allocation7]   ;;  %s4639_s15 = smov [#allocation10]  }
   0x6   :  { %s45_s30 = sshll.u32 %s4638_s29, 4  ;;  %s69_s16 = sshll.u32 %s4639_s15, 4  ;;  %s46_s30 = int_to_ptr.vmem [resolvable:$true] %s45_s30  ;;  %s70_s16 = int_to_ptr.vmem [resolvable:$true] %s69_s16 }
   0x7   :  { %s4428_s19 = scalar_lea.hbm %s5575_s2, 128 }
   0x8   :  { %p4429_p0 = scmp.ne.s32.totalorder %s5575_s2, %s4428_s19  ;;  %p4432_p1 = scmp.lt.u32.totalorder %s4428_s19, %s5575_s2 }
   0xa   :  { %p4434_p2 = pnand %p4432_p1, %p4429_p0 }
   0xc   :  { %4437 = shalt.err (!%p4434_p2)
}
   0xd   :  { %s4438_s24 = scalar_lea.vmem %s46_s30, 128  ;;  %p4443_p4 = scmp.lt.s32.totalorder %s46_s30, %s46_s30 }
   0xe   :  { %p4439_p3 = scmp.ne.s32.totalorder %s46_s30, %s4438_s24  ;;  %p4444_p5 = scmp.lt.s32.totalorder %s4438_s24, %s4438_s24 }
  0x10   :  { %p4445_p6 = por %p4444_p5, %p4443_p4 }
  0x12   :  { %p4446_p7 = pnand %p4445_p6, %p4439_p3 }
  0x14   :  { %4449 = shalt.err (!%p4446_p7)
}
  0x15   :  { %48 = dma.hbm_to_vmem [thread:$0]  %s5575_s2, 128, %s46_s30, [#allocation8]  }
  0x16   :  { %s4450_s29 = scalar_lea.hbm %s5578_s5, 16 }
  0x17   :  { %p4451_p8 = scmp.ne.s32.totalorder %s5578_s5, %s4450_s29  ;;  %p4454_p9 = scmp.lt.u32.totalorder %s4450_s29, %s5578_s5 }
  0x19   :  { %p4456_p10 = pnand %p4454_p9, %p4451_p8 }
  0x1b   :  { %4459 = shalt.err (!%p4456_p10)
}
  0x1c   :  { %s4460_s20 = scalar_lea.vmem %s70_s16, 16  ;;  %s4464_s21 = scalar_lea.vmem %s70_s16, 32 }
  0x1d   :  { %p4461_p11 = scmp.ne.s32.totalorder %s70_s16, %s4460_s20  ;;  %p4465_p12 = scmp.lt.s32.totalorder %s70_s16, %s70_s16 }
  0x1e   :  { %p4466_p13 = scmp.lt.s32.totalorder %s4464_s21, %s4460_s20 }
  0x20   :  { %p4467_p0 = por %p4466_p13, %p4465_p12 }
  0x22   :  { %p4468_p1 = pnand %p4467_p0, %p4461_p11 }
  0x24   :  { %4471 = shalt.err (!%p4468_p1)
}
  0x25   :  { %72 = dma.hbm_to_vmem [thread:$0]  %s5578_s5, 16, %s70_s16, [#allocation11]  }
  0x26   :  { %s4640_s22 = smov [#allocation13]   ;;  %s4472_s26 = scalar_lea.hbm %s5581_s8, 4096 }
  0x27   :  { %s90_s23 = sshll.u32 %s4640_s22, 4  ;;  %p4473_p2 = scmp.ne.s32.totalorder %s5581_s8, %s4472_s26  ;;  %s91_s23 = int_to_ptr.vmem [resolvable:$true] %s90_s23 }
  0x28   :  { %p4476_p3 = scmp.lt.u32.totalorder %s4472_s26, %s5581_s8 }
  0x2a   :  { %p4478_p4 = pnand %p4476_p3, %p4473_p2 }
  0x2c   :  { %4481 = shalt.err (!%p4478_p4)
}
  0x2d   :  { %s4482_s17 = scalar_lea.vmem %s91_s23, 4096  ;;  %p4487_p6 = scmp.lt.s32.totalorder %s91_s23, %s91_s23 }
  0x2e   :  { %p4483_p5 = scmp.ne.s32.totalorder %s91_s23, %s4482_s17  ;;  %p4488_p7 = scmp.lt.s32.totalorder %s4482_s17, %s4482_s17 }
  0x30   :  { %p4489_p8 = por %p4488_p7, %p4487_p6 }
  0x32   :  { %p4490_p9 = pnand %p4489_p8, %p4483_p5 }
  0x34   :  { %4493 = shalt.err (!%p4490_p9)
}
  0x35   :  { %s4641_s5 = smov 256   ;;  %s4642_s16 = smov 16  }
  0x36   :  { %96 = dma.hbm_to_vmem [thread:$0]  %s5581_s8, 4096, %s91_s23, [#allocation14], %s4641_s5, %s4641_s5, %s4642_s16  }
  0x37   :  { %s4643_s20 = smov [#allocation4]   ;;  %s4494_s22 = scalar_lea.hbm %s5574_s1, 448 }
  0x38   :  { %s32_s21 = sshll.u32 %s4643_s20, 4  ;;  %p4495_p10 = scmp.ne.s32.totalorder %s5574_s1, %s4494_s22  ;;  %s33_s21 = int_to_ptr.vmem [resolvable:$true] %s32_s21 }
  0x39   :  { %p4498_p11 = scmp.lt.u32.totalorder %s4494_s22, %s5574_s1 }
  0x3b   :  { %p4500_p12 = pnand %p4498_p11, %p4495_p10 }
  0x3d   :  { %4503 = shalt.err (!%p4500_p12)
}
  0x3e   :  { %s4504_s28 = scalar_lea.vmem %s33_s21, 448  ;;  %p4509_p0 = scmp.lt.s32.totalorder %s33_s21, %s33_s21 }
  0x3f   :  { %p4505_p13 = scmp.ne.s32.totalorder %s33_s21, %s4504_s28  ;;  %p4510_p1 = scmp.lt.s32.totalorder %s4504_s28, %s4504_s28 }
  0x41   :  { %p4511_p2 = por %p4510_p1, %p4509_p0 }
  0x43   :  { %p4512_p3 = pnand %p4511_p2, %p4505_p13 }
  0x45   :  { %4515 = shalt.err (!%p4512_p3)
}
  0x46   :  { %s4644_s8 = smov 64   ;;  %s4645_s23 = smov 4  }
  0x47   :  { %38 = dma.hbm_to_vmem [thread:$0]  %s5574_s1, 448, %s33_s21, [#allocation5], %s4644_s8, %s4644_s8, %s4645_s23  }
  0x48   :  { %s4646_s17 = smov [#allocation9]   ;;  %s4647_s19 = smov [#allocation12]  }
  0x49   :  { %s56_s18 = sshll.u32 %s4646_s17, 4  ;;  %s81_s20 = sshll.u32 %s4647_s19, 4  ;;  %s57_s18 = int_to_ptr.vmem [resolvable:$true] %s56_s18  ;;  %s82_s20 = int_to_ptr.vmem [resolvable:$true] %s81_s20 }
  0x4a   :  { %s4516_s22 = scalar_lea.hbm %s5577_s4, 2048 }
  0x4b   :  { %p4517_p4 = scmp.ne.s32.totalorder %s5577_s4, %s4516_s22  ;;  %p4520_p5 = scmp.lt.u32.totalorder %s4516_s22, %s5577_s4 }
  0x4d   :  { %p4522_p6 = pnand %p4520_p5, %p4517_p4 }
  0x4f   :  { %4525 = shalt.err (!%p4522_p6)
}
  0x50   :  { %s4526_s1 = scalar_lea.vmem %s57_s18, 2048  ;;  %p4531_p8 = scmp.lt.s32.totalorder %s57_s18, %s57_s18 }
  0x51   :  { %p4527_p7 = scmp.ne.s32.totalorder %s57_s18, %s4526_s1  ;;  %p4532_p9 = scmp.lt.s32.totalorder %s4526_s1, %s4526_s1 }
  0x53   :  { %p4533_p10 = por %p4532_p9, %p4531_p8 }
  0x55   :  { %p4534_p11 = pnand %p4533_p10, %p4527_p7 }
  0x57   :  { %4537 = shalt.err (!%p4534_p11)
}
  0x58   :  { %62 = dma.hbm_to_vmem [thread:$0]  %s5577_s4, 2048, %s57_s18, [#allocation8], %s4644_s8, %s4644_s8, %s4645_s23  }
  0x59   :  { %s4538_s17 = scalar_lea.hbm %s5580_s7, 16 }
  0x5a   :  { %p4539_p12 = scmp.ne.s32.totalorder %s5580_s7, %s4538_s17  ;;  %p4542_p13 = scmp.lt.u32.totalorder %s4538_s17, %s5580_s7 }
  0x5c   :  { %p4544_p0 = pnand %p4542_p13, %p4539_p12 }
  0x5e   :  { %4547 = shalt.err (!%p4544_p0)
}
  0x5f   :  { %s4548_s24 = scalar_lea.vmem %s82_s20, 16  ;;  %s4552_s25 = scalar_lea.vmem %s82_s20, 32 }
  0x60   :  { %p4549_p1 = scmp.ne.s32.totalorder %s82_s20, %s4548_s24  ;;  %p4553_p2 = scmp.lt.s32.totalorder %s82_s20, %s82_s20 }
  0x61   :  { %p4554_p3 = scmp.lt.s32.totalorder %s4552_s25, %s4548_s24 }
  0x63   :  { %p4555_p4 = por %p4554_p3, %p4553_p2 }
  0x65   :  { %p4556_p5 = pnand %p4555_p4, %p4549_p1 }
  0x67   :  { %4559 = shalt.err (!%p4556_p5)
}
  0x68   :  { %84 = dma.hbm_to_vmem [thread:$0]  %s5580_s7, 16, %s82_s20, [#allocation11]  }
  0x69   :  { %s4648_s26 = smov [#allocation15]   ;;  %s4649_s1 = smov [#allocation16]  }
  0x6a   :  { %s104_s27 = sshll.u32 %s4648_s26, 4  ;;  %s118_s21 = sshll.u32 %s4649_s1, 4  ;;  %s105_s27 = int_to_ptr.vmem [resolvable:$true] %s104_s27  ;;  %s4811_s21 = int_to_ptr.vmem [resolvable:$true] %s118_s21 }
  0x6b   :  { %s4560_s15 = scalar_lea.hbm %s5583_s10, 4096 }
  0x6c   :  { %p4561_p6 = scmp.ne.s32.totalorder %s5583_s10, %s4560_s15  ;;  %p4564_p7 = scmp.lt.u32.totalorder %s4560_s15, %s5583_s10 }
  0x6e   :  { %p4566_p8 = pnand %p4564_p7, %p4561_p6 }
  0x70   :  { %4569 = shalt.err (!%p4566_p8)
}
  0x71   :  { %s4570_s7 = scalar_lea.vmem %s105_s27, 4096  ;;  %p4575_p10 = scmp.lt.s32.totalorder %s105_s27, %s105_s27 }
  0x72   :  { %p4571_p9 = scmp.ne.s32.totalorder %s105_s27, %s4570_s7  ;;  %p4576_p11 = scmp.lt.s32.totalorder %s4570_s7, %s4570_s7 }
  0x74   :  { %p4577_p12 = por %p4576_p11, %p4575_p10 }
  0x76   :  { %p4578_p13 = pnand %p4577_p12, %p4571_p9 }
  0x78   :  { %4581 = shalt.err (!%p4578_p13)
}
  0x79   :  { %110 = dma.hbm_to_vmem [thread:$0]  %s5583_s10, 4096, %s105_s27, [#allocation14], %s4641_s5, %s4641_s5, %s4642_s16  }
  0x7a   :  { %s4582_s4 = scalar_lea.hbm %s5585_s12, 1024 }
  0x7b   :  { %p4583_p0 = scmp.ne.s32.totalorder %s5585_s12, %s4582_s4  ;;  %p4586_p1 = scmp.lt.u32.totalorder %s4582_s4, %s5585_s12 }
  0x7d   :  { %p4588_p2 = pnand %p4586_p1, %p4583_p0 }
  0x7f   :  { %4591 = shalt.err (!%p4588_p2)
}
  0x80   :  { %s4592_s29 = scalar_lea.vmem %s4811_s21, 1024  ;;  %p4597_p4 = scmp.lt.s32.totalorder %s4811_s21, %s4811_s21 }
  0x81   :  { %p4593_p3 = scmp.ne.s32.totalorder %s4811_s21, %s4592_s29  ;;  %p4598_p5 = scmp.lt.s32.totalorder %s4592_s29, %s4592_s29 }
  0x83   :  { %p4599_p6 = por %p4598_p5, %p4597_p4 }
  0x85   :  { %p4600_p7 = pnand %p4599_p6, %p4593_p3 }
  0x87   :  { %4603 = shalt.err (!%p4600_p7)
}
  0x88   :  { %124 = dma.hbm_to_vmem [thread:$0]  %s5585_s12, 1024, %s4811_s21, [#allocation17], %s4644_s8, %s4644_s8, %s4645_s23  }
  0x89   :  { %4626 = dma.done.wait [#allocation5], 448  }
  0x8a   :  { %4627 = vsyncadd [#allocation5], 4294966848 }
  0x8b   :  { %4628 = dma.done.wait [#allocation8], 2176  }
  0x8c   :  { %4629 = vsyncadd [#allocation8], 4294965120 }
  0x8d   :  { %4630 = dma.done.wait [#allocation11], 32  }
  0x8e   :  { %4631 = vsyncadd [#allocation11], 4294967264 }
  0x8f   :  { %4632 = dma.done.wait [#allocation14], 8192  }
  0x90   :  { %4633 = vsyncadd [#allocation14], 4294959104 }
  0x91   :  { %4634 = dma.done.wait [#allocation17], 1024  }
  0x92   :  { %4635 = vsyncadd [#allocation17], 4294966272  ;;  %vm184_vm0 = vcmask 1042432   ;;  %v152_v0 = vld [vmem:[%s5573_s0] sm:$0x77]  ;;  %v4650_v42 = vmov 0.0   ;;  %v237_v55 = vlaneseq }
  0x93   :  { %v154_v1 = vld [vmem:[%s5573_s0 + $0x10] sm:$0x77]  ;;  %v153_v2 = vld [vmem:[%s5573_s0 + $0x8] sm:$0x77]  ;;  %v168_v3 = vcombine.high %v152_v0, %v152_v0  ;;  %v185_v4 = vsel %vm184_vm0, %v152_v0, 0.0  ;;  %376 = vmatprep.mubr.f32.mxu1 %v4650_v42  ;;  %v4134_v49 = vld [vmem:[#allocation9 + $0x58] sm:$0xff]  }
  0x94   :  { %v170_v5 = vcombine.high %v154_v1, %v154_v1  ;;  %v195_v6 = vsel %vm184_vm0, %v154_v1, 0.0  ;;  %v155_v7 = vld [vmem:[%s5573_s0 + $0x18] sm:$0x77]  ;;  %v156_v8 = vld [vmem:[%s5573_s0 + $0x20] sm:$0x77]  ;;  %v169_v9 = vcombine.high %v153_v2, %v153_v2  ;;  %v190_v10 = vsel %vm184_vm0, %v153_v2, 0.0 }
  0x95   :  { %v171_v11 = vcombine.high %v155_v7, %v155_v7  ;;  %v200_v12 = vsel %vm184_vm0, %v155_v7, 0.0  ;;  %v157_v13 = vld [vmem:[%s5573_s0 + $0x28] sm:$0x77]  ;;  %v158_v14 = vld [vmem:[%s5573_s0 + $0x30] sm:$0x77]  ;;  %v186_v15 = vsel %vm184_vm0, %v168_v3, 0.0  ;;  %v172_v17 = vcombine.high %v156_v8, %v156_v8 }
  0x96   :  { %v196_v16 = vsel %vm184_vm0, %v170_v5, 0.0  ;;  %v205_v18 = vsel %vm184_vm0, %v156_v8, 0.0  ;;  %v159_v19 = vld [vmem:[%s5573_s0 + $0x38] sm:$0x77]  ;;  %v187_v20 = vadd.f32 %v186_v15, %v185_v4  ;;  %v191_v22 = vsel %vm184_vm0, %v169_v9, 0.0  ;;  %v4128_v43 = vld [vmem:[#allocation9 + $0x40] sm:$0xff]  }
  0x97   :  { %v197_v21 = vadd.f32 %v196_v16, %v195_v6  ;;  %v201_v23 = vsel %vm184_vm0, %v171_v11, 0.0  ;;  %v192_v24 = vadd.f32 %v191_v22, %v190_v10  ;;  %v206_v25 = vsel %vm184_vm0, %v172_v17, 0.0  ;;  %v234_v40 = vld [vmem:[#allocation7] sm:$0x77]  ;;  %v4129_v44 = vld [vmem:[#allocation9] sm:$0xff]   ;;  %v4130_v45 = vld [vmem:[#allocation9 + $0x48] sm:$0xff]   ;;  %4022 = vmatprep.subr.bf16.mxu0 %v4128_v43 }
  0x98   :  { %v173_v26 = vcombine.high %v157_v13, %v157_v13  ;;  %188 = vadd.xlane.f32.xlu0 %v187_v20  ;;  %v202_v27 = vadd.f32 %v201_v23, %v200_v12  ;;  %v210_v28 = vsel %vm184_vm0, %v157_v13, 0.0  ;;  %v174_v29 = vcombine.high %v158_v14, %v158_v14  ;;  %4023 = vmatpush3.bf16.msra.mxu0 %v4129_v44  ;;  %v4131_v46 = vld [vmem:[#allocation9 + $0x8] sm:$0xff]   ;;  %v4132_v47 = vld [vmem:[#allocation9 + $0x50] sm:$0xff]   ;;  %v4135_v50 = vld [vmem:[#allocation9 + $0x18] sm:$0xff]  }
  0x99   :  { %198 = vadd.xlane.f32.xlu1 %v197_v21  ;;  %v215_v30 = vsel %vm184_vm0, %v158_v14, 0.0  ;;  %v175_v32 = vcombine.high %v159_v19, %v159_v19  ;;  %v220_v33 = vsel %vm184_vm0, %v159_v19, 0.0  ;;  %v207_v36 = vadd.f32 %v206_v25, %v205_v18  ;;  %4024 = vmatprep.subr.bf16.mxu0 %v4130_v45  ;;  %v4133_v48 = vld [vmem:[#allocation9 + $0x10] sm:$0xff]   ;;  %v4136_v51 = vld [vmem:[#allocation9 + $0x60] sm:$0xff]   ;;  %v4138_v53 = vld [vmem:[#allocation9 + $0x68] sm:$0xff]  }
  0x9a   :  { %v211_v31 = vsel %vm184_vm0, %v173_v26, 0.0  ;;  %v216_v34 = vsel %vm184_vm0, %v174_v29, 0.0  ;;  %v304_v41 = vcombine.high %v234_v40, %v234_v40  ;;  %v4137_v52 = vld [vmem:[#allocation9 + $0x20] sm:$0xff]   ;;  %v4139_v54 = vld [vmem:[#allocation9 + $0x28] sm:$0xff]   ;;  %v4890_v56 = vshrl.u32 %v237_v55, 7  ;;  %v4140_v26 = vld [vmem:[#allocation9 + $0x70] sm:$0xff]  }
  0x9b   :  { %v221_v35 = vsel %vm184_vm0, %v175_v32, 0.0  ;;  %v212_v37 = vadd.f32 %v211_v31, %v210_v28  ;;  %v217_v38 = vadd.f32 %v216_v34, %v215_v30  ;;  %v256_v57 = vand.u32 127, %v237_v55  ;;  %v4142_v28 = vld [vmem:[#allocation9 + $0x78] sm:$0xff]   ;;  %v4160_v31 = vld [vmem:[#allocation13] ss:$16 sps:$4 sm:$0xff]  }
  0x9c   :  { %193 = vadd.xlane.f32.xlu0 %v192_v24  ;;  %v222_v39 = vadd.f32 %v221_v35, %v220_v33  ;;  %3695 = vmatprep.subr.msk.mxu1 %vm184_vm0, %v304_v41  ;;  %vm289_vm1 = vcmask 1041409   ;;  %vm291_vm2 = vcmask 1042434   ;;  %vm293_vm3 = vcmask 1043459   ;;  %v4143_v29 = vld [vmem:[#allocation9 + $0x38] sm:$0xff]   ;;  %v4166_v34 = vld [vmem:[#allocation13 + $0x20] ss:$16 sps:$4 sm:$0xff]  }
  0x9d   :  { %203 = vadd.xlane.f32.xlu1 %v202_v27  ;;  %3696 = vmatpush1.msk.msra.mxu1 %vm184_vm0, %v234_v40  ;;  %v259_v60 = vsub.s32 %v256_v57, %v4890_v56  ;;  %vm295_vm4 = vcmask 1044484   ;;  %vm297_vm5 = vcmask 1045509   ;;  %vm299_vm6 = vcmask 1046534   ;;  %v4141_v27 = vld [vmem:[#allocation9 + $0x30] sm:$0xff]   ;;  %v4144_v30 = vld [vmem:[%s5579_s6 + $0x40] sm:$0xff]  }
  0x9e   :  { %4025 = vmatpush3.bf16.msra.mxu0 %v4131_v46  ;;  %vm301_vm7 = vcmask 1047559   ;;  %vm305_vm8 = vcmask 23552   ;;  %v4162_v32 = vld [vmem:[#allocation13 + $0x4] ss:$16 sps:$4 sm:$0xff]   ;;  %v4184_v40 = vld [vmem:[#allocation13 + $0x80] ss:$16 sps:$4 sm:$0xff]  }
  0x9f   :  { %4026 = vmatprep.subr.bf16.mxu0 %v4132_v47  ;;  %v4168_v33 = vld [vmem:[#allocation13 + $0x24] ss:$16 sps:$4 sm:$0xff]   ;;  %980 = vmatprep.subr.bf16.mxu1 %v4162_v32  ;;  %v4190_v42 = vld [vmem:[#allocation13 + $0xa0] ss:$16 sps:$4 sm:$0xff]   ;;  %v5588_v46 = vmov 0  }
  0xa0   :  { %208 = vadd.xlane.f32.xlu0 %v207_v36  ;;  %v4174_v35 = vld [vmem:[#allocation13 + $0x44] ss:$16 sps:$4 sm:$0xff]   ;;  %v4172_v36 = vld [vmem:[#allocation13 + $0x40] ss:$16 sps:$4 sm:$0xff]   ;;  %v4163_v32 = vld [vmem:[#allocation13 + $0x8] ss:$16 sps:$4 sm:$0xff]  }
  0xa1   :  { %213 = vadd.xlane.f32.xlu1 %v212_v37  ;;  %v4180_v37 = vld [vmem:[#allocation13 + $0x64] ss:$16 sps:$4 sm:$0xff]   ;;  %v4196_v44 = vld [vmem:[#allocation13 + $0xc0] ss:$16 sps:$4 sm:$0xff]  }
  0xa2   :  { %4027 = vmatpush3.bf16.msra.mxu0 %v4133_v48  ;;  %v4192_v41 = vld [vmem:[#allocation13 + $0xa4] ss:$16 sps:$4 sm:$0xff]   ;;  %v4202_v47 = vld [vmem:[#allocation13 + $0xe0] ss:$16 sps:$4 sm:$0xff]  }
  0xa3   :  { %4028 = vmatprep.subr.bf16.mxu0 %v4134_v49  ;;  %v4198_v43 = vld [vmem:[#allocation13 + $0xc4] ss:$16 sps:$4 sm:$0xff]   ;;  %v4899_v49 = vld [vmem:[#allocation4] sm:$0xff]   ;;  %v4917_v55 = vld [vmem:[#allocation15 + $0x40] ss:$16 sps:$4 sm:$0xff]  }
  0xa4   :  { %218 = vadd.xlane.f32.xlu0 %v217_v38  ;;  %v4178_v38 = vld [vmem:[#allocation13 + $0x60] ss:$16 sps:$4 sm:$0xff]   ;;  %v4204_v45 = vld [vmem:[#allocation13 + $0xe4] ss:$16 sps:$4 sm:$0xff]  }
  0xa5   :  { %223 = vadd.xlane.f32.xlu1 %v222_v39  ;;  %v4186_v39 = vld [vmem:[#allocation13 + $0x84] ss:$16 sps:$4 sm:$0xff]  }
  0xa6   :  { %4029 = vmatpush3.bf16.msra.mxu0 %v4135_v50  ;;  %v4897_v48 = vld [vmem:[#allocation15 + $0x4] ss:$16 sps:$4 sm:$0xff]   ;;  %v4901_v50 = vld [vmem:[#allocation15] ss:$16 sps:$4 sm:$0xff]  }
  0xa7   :  { %4030 = vmatprep.subr.bf16.mxu0 %v4136_v51  ;;  %v4904_v51 = vld [vmem:[#allocation15 + $0x24] ss:$16 sps:$4 sm:$0xff]  }
  0xa8   :  { %v4920_v57 = vld [vmem:[#allocation15 + $0x64] ss:$16 sps:$4 sm:$0xff]  }
  0xaa   :  { %4031 = vmatpush3.bf16.msra.mxu0 %v4137_v52  ;;  %v4908_v52 = vld [vmem:[#allocation15 + $0x20] ss:$16 sps:$4 sm:$0xff]  }
  0xab   :  { %4032 = vmatprep.subr.bf16.mxu0 %v4138_v53  ;;  %v4912_v53 = vld [vmem:[#allocation15 + $0x44] ss:$16 sps:$4 sm:$0xff]  }
  0xae   :  { %4033 = vmatpush3.bf16.msra.mxu0 %v4139_v54  ;;  %v4914_v54 = vld [vmem:[#allocation4 + $0x8] sm:$0xff]  }
  0xaf   :  { %4034 = vmatprep.subr.bf16.mxu0 %v4140_v26  ;;  %v4155_v26 = vld [vmem:[%s5579_s6 + $0x28] sm:$0xff]  }
  0xb2   :  { %4035 = vmatpush3.bf16.msra.mxu0 %v4141_v27  ;;  %v4156_v27 = vld [vmem:[%s5579_s6 + $0x70] sm:$0xff]  }
  0xb3   :  { %4036 = vmatprep.subr.bf16.mxu0 %v4142_v28  ;;  %v4157_v28 = vld [vmem:[%s5579_s6 + $0x30] sm:$0xff]  }
  0xb6   :  { %4037 = vmatpush3.bf16.msra.mxu0 %v4143_v29  ;;  %v4158_v29 = vld [vmem:[%s5579_s6 + $0x78] sm:$0xff]  }
  0xb7   :  { %4044 = vmatprep.subr.bf16.mxu0 %v4144_v30  ;;  %v4159_v30 = vld [vmem:[%s5579_s6 + $0x38] sm:$0xff]  }
 0x125   :  { %v189_v58 = vpop.xlane.xlu0 %188 }
 0x126   :  { %v199_v59 = vpop.xlane.xlu1 %198  ;;  %v226_v61 = vmul.f32 0.00390625, %v189_v58  ;;  %v4924_v58 = vld [vmem:[#allocation15 + $0x60] ss:$16 sps:$4 sm:$0xff]  }
 0x127   :  { %v228_v62 = vmul.f32 0.00390625, %v199_v59  ;;  %v4928_v59 = vld [vmem:[#allocation15 + $0x84] ss:$16 sps:$4 sm:$0xff]  }
 0x128   :  { %v260_v3 = vrot.slane %v226_v61, %v259_v60  ;;  %v4933_v61 = vld [vmem:[#allocation15 + $0x80] ss:$16 sps:$4 sm:$0xff]  }
 0x129   :  { %v194_v63 = vpop.xlane.xlu0 %193  ;;  %v268_v6 = vrot.slane %v228_v62, %v259_v60  ;;  %v4936_v62 = vld [vmem:[#allocation15 + $0xa4] ss:$16 sps:$4 sm:$0xff]  }
 0x12a   :  { %v204_v0 = vpop.xlane.xlu1 %203  ;;  %v227_v1 = vmul.f32 0.00390625, %v194_v63  ;;  %v4940_v63 = vld [vmem:[#allocation15 + $0xa0] ss:$16 sps:$4 sm:$0xff]  }
 0x12b   :  { %v229_v2 = vmul.f32 0.00390625, %v204_v0  ;;  %v4944_v0 = vld [vmem:[#allocation15 + $0xc4] ss:$16 sps:$4 sm:$0xff]  }
 0x12c   :  { %v264_v4 = vrot.slane %v227_v1, %v259_v60  ;;  %v4946_v1 = vld [vmem:[#allocation4 + $0x18] ss:$0 sps:$4 sm:$0xff]  }
 0x12d   :  { %v272_v5 = vrot.slane %v229_v2, %v259_v60  ;;  %v209_v7 = vpop.xlane.xlu0 %208  ;;  %v4949_v2 = vld [vmem:[#allocation15 + $0xc0] ss:$16 sps:$4 sm:$0xff]  }
 0x12e   :  { %v214_v8 = vpop.xlane.xlu1 %213  ;;  %v290_v9 = vsel %vm289_vm1, %v264_v4, %v260_v3  ;;  %v230_v10 = vmul.f32 0.00390625, %v209_v7  ;;  %v4956_v3 = vsub.s32 0, %v4890_v56  ;;  %v235_v4 = vld [vmem:[%s5576_s3] sm:$0x3] }
 0x12f   :  { %v231_v11 = vmul.f32 0.00390625, %v214_v8  ;;  %v292_v12 = vsel %vm291_vm2, %v268_v6, %v290_v9 }
 0x130   :  { %v294_v13 = vsel %vm293_vm3, %v272_v5, %v292_v12  ;;  %v276_v14 = vrot.slane %v230_v10, %v259_v60  ;;  %v4962_v5 = vsub.s32 1, %v4890_v56  ;;  %v240_v6 = vrot.slane %v235_v4, %v4956_v3 }
 0x131   :  { %v280_v15 = vrot.slane %v231_v11, %v259_v60  ;;  %v219_v16 = vpop.xlane.xlu0 %218 }
 0x132   :  { %v224_v17 = vpop.xlane.xlu1 %223  ;;  %v296_v18 = vsel %vm295_vm4, %v276_v14, %v294_v13  ;;  %v232_v19 = vmul.f32 0.00390625, %v219_v16  ;;  %v244_v7 = vrot.slane %v235_v4, %v4962_v5  ;;  %v5012_v4 = vld [vmem:[#allocation15 + $0xc] ss:$16 sps:$4 sm:$0xff]  }
 0x133   :  { %v233_v20 = vmul.f32 0.00390625, %v224_v17  ;;  %v298_v23 = vsel %vm297_vm5, %v280_v15, %v296_v18  ;;  %v4145_v15 = vld [vmem:[%s5579_s6] sm:$0xff]   ;;  %v4146_v17 = vld [vmem:[%s5579_s6 + $0x48] sm:$0xff]  }
 0x134   :  { %v284_v21 = vrot.slane %v232_v19, %v259_v60  ;;  %v4147_v18 = vld [vmem:[%s5579_s6 + $0x8] sm:$0xff]   ;;  %v4148_v19 = vld [vmem:[%s5579_s6 + $0x50] sm:$0xff]  }
 0x135   :  { %v288_v22 = vrot.slane %v233_v20, %v259_v60  ;;  %v4930_v60 = vld [vmem:[#allocation4 + $0x10] sm:$0xff]  }
 0x136   :  { %v300_v24 = vsel %vm299_vm6, %v284_v21, %v298_v23  ;;  %v4149_v20 = vld [vmem:[%s5579_s6 + $0x10] sm:$0xff]   ;;  %v4150_v21 = vld [vmem:[%s5579_s6 + $0x58] sm:$0xff]   ;;  %v4152_v23 = vld [vmem:[%s5579_s6 + $0x60] sm:$0xff]  }
 0x137   :  { %v302_v25 = vsel %vm301_vm7, %v288_v22, %v300_v24  ;;  %v4151_v22 = vld [vmem:[%s5579_s6 + $0x18] sm:$0xff]   ;;  %v4153_v24 = vld [vmem:[%s5579_s6 + $0x20] sm:$0xff]  }
 0x138   :  { %3697 = vmatmul.mubr.msk.f32.vlgmr.msra.gmra.mrb[0].mxu1 %vm305_vm8, %v302_v25  ;;  %v4154_v25 = vld [vmem:[%s5579_s6 + $0x68] sm:$0xff]  }
 0x139   :  { %981 = vmatpush1.bf16.msra.mxu1 %v4160_v31  ;;  %1012 = vmatprep.mubr.bf16.mxu1 %v5588_v46  ;;  %v4165_v31 = vld [vmem:[#allocation13 + $0xc] ss:$16 sps:$4 sm:$0xff]  }
 0x13a   :  { %982 = vmatprep.subr.bf16.mxu1 %v4168_v33  ;;  %v4171_v33 = vld [vmem:[#allocation13 + $0x2c] ss:$16 sps:$4 sm:$0xff]  }
 0x13d   :  { %983 = vmatpush1.bf16.msra.mxu1 %v4166_v34  ;;  %v4169_v34 = vld [vmem:[#allocation13 + $0x28] ss:$16 sps:$4 sm:$0xff]  }
 0x13e   :  { %984 = vmatprep.subr.bf16.mxu1 %v4174_v35  ;;  %v4177_v35 = vld [vmem:[#allocation13 + $0x4c] ss:$16 sps:$4 sm:$0xff]  }
 0x141   :  { %985 = vmatpush1.bf16.msra.mxu1 %v4172_v36  ;;  %v4175_v36 = vld [vmem:[#allocation13 + $0x48] ss:$16 sps:$4 sm:$0xff]  }
 0x142   :  { %986 = vmatprep.subr.bf16.mxu1 %v4180_v37  ;;  %v4183_v37 = vld [vmem:[#allocation13 + $0x6c] ss:$16 sps:$4 sm:$0xff]  }
 0x145   :  { %987 = vmatpush1.bf16.msra.mxu1 %v4178_v38  ;;  %v4181_v38 = vld [vmem:[#allocation13 + $0x68] ss:$16 sps:$4 sm:$0xff]  }
 0x146   :  { %988 = vmatprep.subr.bf16.mxu1 %v4186_v39  ;;  %v4189_v39 = vld [vmem:[#allocation13 + $0x8c] ss:$16 sps:$4 sm:$0xff]  }
 0x149   :  { %989 = vmatpush1.bf16.msra.mxu1 %v4184_v40  ;;  %v4187_v40 = vld [vmem:[#allocation13 + $0x88] ss:$16 sps:$4 sm:$0xff]  }
 0x14a   :  { %990 = vmatprep.subr.bf16.mxu1 %v4192_v41  ;;  %v4195_v41 = vld [vmem:[#allocation13 + $0xac] ss:$16 sps:$4 sm:$0xff]  }
 0x14d   :  { %991 = vmatpush1.bf16.msra.mxu1 %v4190_v42  ;;  %v4193_v42 = vld [vmem:[#allocation13 + $0xa8] ss:$16 sps:$4 sm:$0xff]  }
 0x14e   :  { %992 = vmatprep.subr.bf16.mxu1 %v4198_v43  ;;  %v4201_v43 = vld [vmem:[#allocation13 + $0xcc] ss:$16 sps:$4 sm:$0xff]  }
 0x151   :  { %993 = vmatpush1.bf16.msra.mxu1 %v4196_v44  ;;  %v4199_v44 = vld [vmem:[#allocation13 + $0xc8] ss:$16 sps:$4 sm:$0xff]  }
 0x152   :  { %994 = vmatprep.subr.bf16.mxu1 %v4204_v45  ;;  %v4207_v45 = vld [vmem:[#allocation13 + $0xec] ss:$16 sps:$4 sm:$0xff]  }
 0x155   :  { %995 = vmatpush1.bf16.msra.mxu1 %v4202_v47  ;;  %v4205_v47 = vld [vmem:[#allocation13 + $0xe8] ss:$16 sps:$4 sm:$0xff]  }
 0x156   :  { %1350 = vmatprep.subr.bf16.mxu1 %v4897_v48 }
 0x158   :  { %1013 = vmatmul.mubr.bf16.vlgmr.msra.gmra.mrb[4].mxu1 %v4899_v49 }
 0x159   :  { %1351 = vmatpush1.bf16.msra.mxu1 %v4901_v50  ;;  %1022 = vmatprep.mubr.bf16.mxu1 %v5588_v46 }
 0x15a   :  { %1352 = vmatprep.subr.bf16.mxu1 %v4904_v51 }
 0x15d   :  { %1353 = vmatpush1.bf16.msra.mxu1 %v4908_v52 }
 0x15e   :  { %1354 = vmatprep.subr.bf16.mxu1 %v4912_v53 }
 0x160   :  { %1023 = vmatmul.mubr.bf16.gmra.mrb[8].mxu1 %v4914_v54 }
 0x161   :  { %1355 = vmatpush1.bf16.msra.mxu1 %v4917_v55  ;;  %1032 = vmatprep.mubr.bf16.mxu1 %v5588_v46 }
 0x162   :  { %1356 = vmatprep.subr.bf16.mxu1 %v4920_v57 }
 0x165   :  { %1357 = vmatpush1.bf16.msra.mxu1 %v4924_v58 }
 0x166   :  { %1358 = vmatprep.subr.bf16.mxu1 %v4928_v59 }
 0x168   :  { %1033 = vmatmul.mubr.bf16.gmra.mrb[12].mxu1 %v4930_v60 }
 0x169   :  { %1359 = vmatpush1.bf16.msra.mxu1 %v4933_v61  ;;  %1042 = vmatprep.mubr.bf16.mxu1 %v5588_v46 }
 0x16a   :  { %1360 = vmatprep.subr.bf16.mxu1 %v4936_v62 }
 0x16d   :  { %1361 = vmatpush1.bf16.msra.mxu1 %v4940_v63 }
 0x16e   :  { %1362 = vmatprep.subr.bf16.mxu1 %v4944_v0 }
 0x170   :  { %1043 = vmatmul.mubr.bf16.gmra.mrb[16].mxu1 %v4946_v1 }
 0x171   :  { %1363 = vmatpush1.bf16.msra.mxu1 %v4949_v2  ;;  %1382 = vmatprep.mubr.bf16.mxu1 %v5588_v46 }
 0x20b   :  { %v378_v8 = vpop.f32.mrb[0].mxu1 }
 0x20c   :  { %v379_v9 = vadd.f32 %v378_v8, %v240_v6  ;;  %v380_v10 = vpop.f32.mrb[1].mxu1  ;;  %v5014_v6 = vld [vmem:[#allocation15 + $0x8] ss:$16 sps:$4 sm:$0xff]  }
 0x20d   :  { %v381_v11 = vadd.f32 %v380_v10, %v244_v7  ;;  %v5017_v7 = vld [vmem:[#allocation15 + $0x2c] ss:$16 sps:$4 sm:$0xff]   ;;  %v5021_v8 = vld [vmem:[#allocation15 + $0x28] ss:$16 sps:$4 sm:$0xff]  }
 0x20e   :  { %v383_v12 = vmax.f32 %v379_v9, 0.0  ;;  %v5025_v9 = vld [vmem:[#allocation15 + $0x4c] ss:$16 sps:$4 sm:$0xff]   ;;  %v5028_v10 = vld [vmem:[#allocation15 + $0x48] ss:$16 sps:$4 sm:$0xff]  }
 0x20f   :  { %v384_v13 = vmax.f32 %v381_v11, 0.0  ;;  %v5031_v11 = vld [vmem:[#allocation15 + $0x6c] ss:$16 sps:$4 sm:$0xff]  }
 0x210   :  { %v385_v16 = vpack.c.bf16 %v383_v12, %v383_v12  ;;  %v5039_v12 = vld [vmem:[#allocation15 + $0x8c] ss:$16 sps:$4 sm:$0xff]  }
 0x211   :  { %v386_v14 = vpack.c.bf16 %v384_v13, %v384_v13  ;;  %v5042_v13 = vld [vmem:[#allocation15 + $0x88] ss:$16 sps:$4 sm:$0xff]  }
 0x213   :  { %554 = vmatprep.mubr.bf16.mxu0 %v386_v14 }
 0x214   :  { %555 = vmatmul.mubr.bf16.vlgmr.msra.gmra.mrb[0].mxu0 %v385_v16 }
 0x215   :  { %4045 = vmatpush3.bf16.msra.mxu0 %v4145_v15  ;;  %729 = vmatprep.mubr.bf16.mxu0 %v386_v14  ;;  %v5045_v14 = vld [vmem:[#allocation15 + $0xac] ss:$16 sps:$4 sm:$0xff]  }
 0x216   :  { %4046 = vmatprep.subr.bf16.mxu0 %v4146_v17  ;;  %v5053_v15 = vld [vmem:[#allocation15 + $0xcc] ss:$16 sps:$4 sm:$0xff]   ;;  %v5059_v17 = vld [vmem:[#allocation15 + $0xe4] ss:$16 sps:$4 sm:$0xff]  }
 0x217   :  { %1364 = vmatprep.subr.bf16.mxu1 %v5059_v17 }
 0x219   :  { %4047 = vmatpush3.bf16.msra.mxu0 %v4147_v18  ;;  %v5061_v18 = vld [vmem:[#allocation15 + $0xec] ss:$16 sps:$4 sm:$0xff]  }
 0x21a   :  { %4048 = vmatprep.subr.bf16.mxu0 %v4148_v19  ;;  %v5069_v19 = vld [vmem:[#allocation15 + $0xe8] ss:$16 sps:$4 sm:$0xff]  }
 0x21d   :  { %4049 = vmatpush3.bf16.msra.mxu0 %v4149_v20 }
 0x21e   :  { %4050 = vmatprep.subr.bf16.mxu0 %v4150_v21 }
 0x221   :  { %4051 = vmatpush3.bf16.msra.mxu0 %v4151_v22 }
 0x222   :  { %4052 = vmatprep.subr.bf16.mxu0 %v4152_v23 }
 0x225   :  { %4053 = vmatpush3.bf16.msra.mxu0 %v4153_v24 }
 0x226   :  { %4054 = vmatprep.subr.bf16.mxu0 %v4154_v25 }
 0x229   :  { %4055 = vmatpush3.bf16.msra.mxu0 %v4155_v26 }
 0x22a   :  { %4056 = vmatprep.subr.bf16.mxu0 %v4156_v27 }
 0x22b   :  { %v5085_v21 = vpop.f32.mrb[4].mxu1 }
 0x22c   :  { %v5091_v23 = vpop.f32.mrb[5].mxu1 }
 0x22d   :  { %4057 = vmatpush3.bf16.msra.mxu0 %v4157_v28  ;;  %v1018_v24 = vpop.f32.mrb[6].mxu1 }
 0x22e   :  { %4058 = vmatprep.subr.bf16.mxu0 %v4158_v29  ;;  %v1020_v26 = vpop.f32.mrb[7].mxu1 }
 0x231   :  { %4059 = vmatpush3.bf16.msra.mxu0 %v4159_v30 }
 0x232   :  { %1051 = vmatprep.subr.bf16.mxu0 %v4165_v31 }
 0x233   :  { %v1024_v28 = vpop.f32.mrb[8].mxu1 }
 0x234   :  { %730 = vmatmul.mubr.bf16.vlgmr.msra.gmra.mrb[4].mxu0 %v385_v16  ;;  %v5056_v16 = vld [vmem:[#allocation15 + $0xc8] ss:$16 sps:$4 sm:$0xff]   ;;  %v1026_v30 = vpop.f32.mrb[9].mxu1 }
 0x235   :  { %1052 = vmatpush1.bf16.msra.mxu0 %v4163_v32  ;;  %1083 = vmatprep.mubr.bf16.mxu0 %v5588_v46  ;;  %v1028_v32 = vpop.f32.mrb[10].mxu1 }
 0x236   :  { %1053 = vmatprep.subr.bf16.mxu0 %v4171_v33 }
 0x239   :  { %1054 = vmatpush1.bf16.msra.mxu0 %v4169_v34  ;;  %v1030_v34 = vpop.f32.mrb[11].mxu1 }
 0x23a   :  { %1055 = vmatprep.subr.bf16.mxu0 %v4177_v35 }
 0x23d   :  { %1056 = vmatpush1.bf16.msra.mxu0 %v4175_v36  ;;  %v1034_v36 = vpop.f32.mrb[12].mxu1 }
 0x23e   :  { %1057 = vmatprep.subr.bf16.mxu0 %v4183_v37 }
 0x241   :  { %1058 = vmatpush1.bf16.msra.mxu0 %v4181_v38  ;;  %v1036_v38 = vpop.f32.mrb[13].mxu1 }
 0x242   :  { %1059 = vmatprep.subr.bf16.mxu0 %v4189_v39 }
 0x245   :  { %1060 = vmatpush1.bf16.msra.mxu0 %v4187_v40  ;;  %v1038_v40 = vpop.f32.mrb[14].mxu1 }
 0x246   :  { %1061 = vmatprep.subr.bf16.mxu0 %v4195_v41 }
 0x249   :  { %1062 = vmatpush1.bf16.msra.mxu0 %v4193_v42  ;;  %v1040_v42 = vpop.f32.mrb[15].mxu1 }
 0x24a   :  { %1063 = vmatprep.subr.bf16.mxu0 %v4201_v43 }
 0x24d   :  { %1064 = vmatpush1.bf16.msra.mxu0 %v4199_v44  ;;  %v1044_v44 = vpop.f32.mrb[16].mxu1 }
 0x24e   :  { %1065 = vmatprep.subr.bf16.mxu0 %v4207_v45 }
 0x251   :  { %1066 = vmatpush1.bf16.msra.mxu0 %v4205_v47  ;;  %v1046_v47 = vpop.f32.mrb[17].mxu1 }
 0x252   :  { %1391 = vmatprep.subr.bf16.mxu0 %v5012_v4 }
 0x254   :  { %1084 = vmatmul.mubr.bf16.vlgmr.msra.gmra.mrb[8].mxu0 %v4899_v49  ;;  %v5035_v49 = vld [vmem:[#allocation15 + $0x68] ss:$16 sps:$4 sm:$0xff]  }
 0x255   :  { %1392 = vmatpush1.bf16.msra.mxu0 %v5014_v6  ;;  %1093 = vmatprep.mubr.bf16.mxu0 %v5588_v46 }
 0x256   :  { %1393 = vmatprep.subr.bf16.mxu0 %v5017_v7 }
 0x259   :  { %1394 = vmatpush1.bf16.msra.mxu0 %v5021_v8 }
 0x25a   :  { %1395 = vmatprep.subr.bf16.mxu0 %v5025_v9 }
 0x25c   :  { %1094 = vmatmul.mubr.bf16.gmra.mrb[12].mxu0 %v4914_v54  ;;  %v5049_v54 = vld [vmem:[#allocation15 + $0xa8] ss:$16 sps:$4 sm:$0xff]  }
 0x25d   :  { %1396 = vmatpush1.bf16.msra.mxu0 %v5028_v10  ;;  %1103 = vmatprep.mubr.bf16.mxu0 %v5588_v46 }
 0x25e   :  { %1397 = vmatprep.subr.bf16.mxu0 %v5031_v11 }
 0x261   :  { %1398 = vmatpush1.bf16.msra.mxu0 %v5035_v49 }
 0x262   :  { %1399 = vmatprep.subr.bf16.mxu0 %v5039_v12 }
 0x264   :  { %1104 = vmatmul.mubr.bf16.gmra.mrb[16].mxu0 %v4930_v60  ;;  %v5063_v60 = vld [vmem:[#allocation15 + $0xe0] ss:$16 sps:$4 sm:$0xff]  }
 0x265   :  { %1400 = vmatpush1.bf16.msra.mxu0 %v5042_v13  ;;  %1113 = vmatprep.mubr.bf16.mxu0 %v5588_v46 }
 0x266   :  { %1401 = vmatprep.subr.bf16.mxu0 %v5045_v14  ;;  %1365 = vmatpush1.bf16.msra.mxu1 %v5063_v60 }
 0x267   :  { %1687 = vmatprep.subr.bf16.mxu1 %v4897_v48 }
 0x269   :  { %1402 = vmatpush1.bf16.msra.mxu0 %v5049_v54 }
 0x26a   :  { %1403 = vmatprep.subr.bf16.mxu0 %v5053_v15 }
 0x26c   :  { %1114 = vmatmul.mubr.bf16.gmra.mrb[20].mxu0 %v4946_v1  ;;  %v5079_v1 = vld [vmem:[%s5582_s9] sm:$0xf] }
 0x26d   :  { %1404 = vmatpush1.bf16.msra.mxu0 %v5056_v16  ;;  %1423 = vmatprep.mubr.bf16.mxu0 %v5588_v46  ;;  %v5083_v20 = vrot.slane %v5079_v1, %v4956_v3  ;;  %v5089_v22 = vrot.slane %v5079_v1, %v4962_v5 }
 0x26e   :  { %1405 = vmatprep.subr.bf16.mxu0 %v5061_v18 }
 0x26f   :  { %v5094_v25 = vadd.f32 %v1018_v24, %v5083_v20  ;;  %v5097_v27 = vadd.f32 %v1020_v26, %v5089_v22  ;;  %v5100_v29 = vadd.f32 %v1024_v28, %v5083_v20  ;;  %v5103_v31 = vadd.f32 %v1026_v30, %v5089_v22  ;;  %v1048_v26 = vpop.f32.mrb[18].mxu1 }
 0x270   :  { %v5106_v33 = vadd.f32 %v1028_v32, %v5083_v20  ;;  %v5109_v35 = vadd.f32 %v1030_v34, %v5089_v22  ;;  %v5112_v37 = vadd.f32 %v1034_v36, %v5083_v20  ;;  %v5115_v39 = vadd.f32 %v1036_v38, %v5089_v22  ;;  %v1049_v28 = vpop.f32.mrb[19].mxu1  ;;  %v3698_v32 = vld [vmem:[#allocation10] ss:$0 sm:$0xff] }
 0x271   :  { %1406 = vmatpush1.bf16.msra.mxu0 %v5069_v19  ;;  %5591 = vst [vmem:[#allocation25_spill] sm:$0xff] %v5097_v27  ;;  %5592 = vst [vmem:[#allocation26_spill] sm:$0xff] %v5100_v29  ;;  %v5118_v41 = vadd.f32 %v1038_v40, %v5083_v20  ;;  %v5121_v43 = vadd.f32 %v1040_v42, %v5089_v22  ;;  %v5124_v45 = vadd.f32 %v1044_v44, %v5083_v20  ;;  %v5602_v42 = vmov 0  }
 0x272   :  { %1728 = vmatprep.subr.bf16.mxu0 %v5012_v4  ;;  %5593 = vst [vmem:[#allocation27_spill] sm:$0xff] %v5103_v31  ;;  %5594 = vst [vmem:[#allocation28_spill] sm:$0xff] %v5106_v33  ;;  %v5127_v24 = vadd.f32 %v1046_v47, %v5089_v22  ;;  %v5166_v28 = vsub.s32 2, %v4890_v56 }
 0x273   :  { %5595 = vst [vmem:[#allocation29_spill] sm:$0xff] %v5109_v35  ;;  %5596 = vst [vmem:[#allocation30_spill] sm:$0xff] %v5112_v37 }
 0x274   :  { %5597 = vst [vmem:[#allocation31_spill] sm:$0xff] %v5115_v39  ;;  %5598 = vst [vmem:[#allocation32_spill] sm:$0xff] %v5118_v41 }
 0x275   :  { %5599 = vst [vmem:[#allocation33_spill] sm:$0xff] %v5121_v43  ;;  %5600 = vst [vmem:[#allocation34_spill] sm:$0xff] %v5124_v45 }
 0x276   :  { %5601 = vst [vmem:[#allocation35_spill] sm:$0xff] %v5127_v24 }
 0x2e7   :  { %v4038_v30 = vpop.f32.mrb[0].mxu0 }
 0x2e8   :  { %v4039_v34 = vpop.f32.mrb[1].mxu0 }
 0x2e9   :  { %v4040_v36 = vadd.f32 %v4039_v34, %v4038_v30  ;;  %v4041_v38 = vpop.f32.mrb[2].mxu0  ;;  %v5169_v30 = vsub.s32 3, %v4890_v56 }
 0x2ea   :  { %v4042_v40 = vpop.f32.mrb[3].mxu0 }
 0x2eb   :  { %v557_v46 = vadd.f32 %v4040_v36, %v3698_v32  ;;  %v789_v32 = vrot.slane %v5079_v1, %v5166_v28  ;;  %v793_v36 = vrot.slane %v5079_v1, %v5169_v30 }
 0x2ed   :  { %v1157_v41 = vpack.c.bf16 %v557_v46, %v557_v46 }
 0x2ef   :  { %1383 = vmatmul.mubr.bf16.vlgmr.msra.gmra.mrb[20].mxu1 %v1157_v41  ;;  %1424 = vmatmul.mubr.bf16.vlgmr.msra.gmra.mrb[24].mxu0 %v1157_v41 }
 0x2f0   :  { %1688 = vmatpush1.bf16.msra.mxu1 %v4901_v50  ;;  %1729 = vmatpush1.bf16.msra.mxu0 %v5014_v6 }
 0x2f1   :  { %1689 = vmatprep.subr.bf16.mxu1 %v4904_v51  ;;  %1730 = vmatprep.subr.bf16.mxu0 %v5017_v7 }
 0x2f2   :  { %1719 = vmatprep.mubr.bf16.mxu1 %v5602_v42  ;;  %1760 = vmatprep.mubr.bf16.mxu0 %v5602_v42 }
 0x2f4   :  { %1690 = vmatpush1.bf16.msra.mxu1 %v4908_v52  ;;  %1731 = vmatpush1.bf16.msra.mxu0 %v5021_v8 }
 0x2f5   :  { %1691 = vmatprep.subr.bf16.mxu1 %v4912_v53  ;;  %1732 = vmatprep.subr.bf16.mxu0 %v5025_v9 }
 0x2f8   :  { %1692 = vmatpush1.bf16.msra.mxu1 %v4917_v55  ;;  %1733 = vmatpush1.bf16.msra.mxu0 %v5028_v10 }
 0x2f9   :  { %1693 = vmatprep.subr.bf16.mxu1 %v4920_v57  ;;  %1734 = vmatprep.subr.bf16.mxu0 %v5031_v11 }
 0x2fc   :  { %1694 = vmatpush1.bf16.msra.mxu1 %v4924_v58  ;;  %1735 = vmatpush1.bf16.msra.mxu0 %v5035_v49 }
 0x2fd   :  { %1695 = vmatprep.subr.bf16.mxu1 %v4928_v59  ;;  %1736 = vmatprep.subr.bf16.mxu0 %v5039_v12 }
 0x300   :  { %1696 = vmatpush1.bf16.msra.mxu1 %v4933_v61  ;;  %1737 = vmatpush1.bf16.msra.mxu0 %v5042_v13 }
 0x301   :  { %1697 = vmatprep.subr.bf16.mxu1 %v4936_v62  ;;  %1738 = vmatprep.subr.bf16.mxu0 %v5045_v14 }
 0x304   :  { %1698 = vmatpush1.bf16.msra.mxu1 %v4940_v63  ;;  %1739 = vmatpush1.bf16.msra.mxu0 %v5049_v54 }
 0x305   :  { %1699 = vmatprep.subr.bf16.mxu1 %v4944_v0  ;;  %1740 = vmatprep.subr.bf16.mxu0 %v5053_v15 }
 0x307   :  { %v4060_v46 = vpop.f32.mrb[4].mxu0 }
 0x308   :  { %v4061_v41 = vpop.f32.mrb[5].mxu0  ;;  %1700 = vmatpush1.bf16.msra.mxu1 %v4949_v2  ;;  %1741 = vmatpush1.bf16.msra.mxu0 %v5056_v16 }
 0x309   :  { %v5157_v44 = vadd.f32 %v4061_v41, %v4060_v46  ;;  %v4063_v47 = vpop.f32.mrb[6].mxu0  ;;  %1701 = vmatprep.subr.bf16.mxu1 %v5059_v17  ;;  %1742 = vmatprep.subr.bf16.mxu0 %v5061_v18 }
 0x30a   :  { %v4064_v26 = vpop.f32.mrb[7].mxu0 }
 0x30c   :  { %1702 = vmatpush1.bf16.msra.mxu1 %v5063_v60  ;;  %1743 = vmatpush1.bf16.msra.mxu0 %v5069_v19 }
 0x30d   :  { %2025 = vmatprep.subr.bf16.mxu1 %v4897_v48  ;;  %2066 = vmatprep.subr.bf16.mxu0 %v5012_v4 }
 0x327   :  { %v1085_v34 = vpop.f32.mrb[8].mxu0 }
 0x328   :  { %v1087_v38 = vpop.f32.mrb[9].mxu0 }
 0x329   :  { %v1089_v40 = vpop.f32.mrb[10].mxu0 }
 0x32a   :  { %v5175_v46 = vadd.f32 %v1089_v40, %v789_v32  ;;  %v1091_v48 = vpop.f32.mrb[11].mxu0 }
 0x32b   :  { %v5177_v41 = vadd.f32 %v1091_v48, %v793_v36 }
 0x32c   :  { %5603 = vst [vmem:[#allocation36_spill] sm:$0xff] %v5175_v46 }
 0x32d   :  { %5604 = vst [vmem:[#allocation37_spill] sm:$0xff] %v5177_v41 }
 0x32f   :  { %v1095_v4 = vpop.f32.mrb[12].mxu0 }
 0x330   :  { %v5179_v47 = vadd.f32 %v1095_v4, %v789_v32  ;;  %v1097_v26 = vpop.f32.mrb[13].mxu0 }
 0x331   :  { %v5181_v56 = vadd.f32 %v1097_v26, %v793_v36  ;;  %v1099_v24 = vpop.f32.mrb[14].mxu0 }
 0x332   :  { %5605 = vst [vmem:[#allocation38_spill] sm:$0xff] %v5179_v47  ;;  %v5183_v45 = vadd.f32 %v1099_v24, %v789_v32  ;;  %v1101_v43 = vpop.f32.mrb[15].mxu0 }
 0x333   :  { %5606 = vst [vmem:[#allocation39_spill] sm:$0xff] %v5181_v56  ;;  %v5185_v39 = vadd.f32 %v1101_v43, %v793_v36 }
 0x334   :  { %5607 = vst [vmem:[#allocation40_spill] sm:$0xff] %v5183_v45 }
 0x335   :  { %5608 = vst [vmem:[#allocation41_spill] sm:$0xff] %v5185_v39 }
 0x337   :  { %v1105_v1 = vpop.f32.mrb[16].mxu0 }
 0x338   :  { %v5187_v37 = vadd.f32 %v1105_v1, %v789_v32  ;;  %v1107_v40 = vpop.f32.mrb[17].mxu0  ;;  %v1436_v1 = vld [vmem:[%s5584_s11] sm:$0xf] }
 0x339   :  { %v5189_v35 = vadd.f32 %v1107_v40, %v793_v36  ;;  %v1109_v48 = vpop.f32.mrb[18].mxu0  ;;  %v1015_v40 = vadd.f32 %v5085_v21, %v5083_v20 }
 0x33a   :  { %5609 = vst [vmem:[#allocation42_spill] sm:$0xff] %v5187_v37  ;;  %v5191_v33 = vadd.f32 %v1109_v48, %v789_v32  ;;  %v1111_v4 = vpop.f32.mrb[19].mxu0  ;;  %v1086_v48 = vadd.f32 %v1085_v34, %v789_v32 }
 0x33b   :  { %5610 = vst [vmem:[#allocation43_spill] sm:$0xff] %v5189_v35  ;;  %v5193_v31 = vadd.f32 %v1111_v4, %v793_v36  ;;  %v1017_v4 = vadd.f32 %v5091_v23, %v5089_v22  ;;  %v1453_v22 = vrot.slane %v1436_v1, %v5169_v30 }
 0x33c   :  { %5611 = vst [vmem:[#allocation44_spill] sm:$0xff] %v5191_v33  ;;  %v1441_v33 = vrot.slane %v1436_v1, %v4956_v3 }
 0x33d   :  { %5612 = vst [vmem:[#allocation45_spill] sm:$0xff] %v5193_v31 }
 0x33f   :  { %v1115_v26 = vpop.f32.mrb[20].mxu0 }
 0x340   :  { %v5195_v56 = vadd.f32 %v1115_v26, %v789_v32  ;;  %v1117_v24 = vpop.f32.mrb[21].mxu0  ;;  %v1088_v26 = vadd.f32 %v1087_v38, %v793_v36 }
 0x341   :  { %v5197_v45 = vadd.f32 %v1117_v24, %v793_v36  ;;  %v1119_v43 = vpop.f32.mrb[22].mxu0  ;;  %v1445_v24 = vrot.slane %v1436_v1, %v4962_v5  ;;  %v1449_v36 = vrot.slane %v1436_v1, %v5166_v28 }
 0x342   :  { %5613 = vst [vmem:[#allocation46_spill] sm:$0xff] %v5195_v56  ;;  %v1120_v39 = vpop.f32.mrb[23].mxu0 }
 0x343   :  { %5614 = vst [vmem:[#allocation47_spill] sm:$0xff] %v5197_v45 }
 0x3c2   :  { %v1384_v56 = vpop.f32.mrb[20].mxu1  ;;  %v1425_v31 = vpop.f32.mrb[24].mxu0 }
 0x3c3   :  { %v1432_v43 = vadd.f32 %v1384_v56, %v1015_v40  ;;  %v1434_v39 = vadd.f32 %v1425_v31, %v1086_v48  ;;  %v1386_v45 = vpop.f32.mrb[21].mxu1  ;;  %v1427_v35 = vpop.f32.mrb[25].mxu0 }
 0x3c4   :  { %v1433_v37 = vadd.f32 %v1386_v45, %v1017_v4  ;;  %v1435_v47 = vadd.f32 %v1427_v35, %v1088_v26  ;;  %v1388_v29 = vpop.f32.mrb[22].mxu1  ;;  %v1429_v41 = vpop.f32.mrb[26].mxu0 }
 0x3c5   :  { %v1458_v20 = vadd.f32 %v1441_v33, %v1432_v43  ;;  %v1389_v21 = vpop.f32.mrb[23].mxu1  ;;  %v1430_v32 = vpop.f32.mrb[27].mxu0  ;;  %v1460_v38 = vadd.f32 %v1449_v36, %v1434_v39  ;;  %v3715_v33 = vld [vmem:[#allocation12] ss:$0 sm:$0xff] }
 0x3c6   :  { %v1459_v34 = vadd.f32 %v1445_v24, %v1433_v37  ;;  %v1461_v23 = vadd.f32 %v1453_v22, %v1435_v47 }
 0x3c7   :  { %v3800_v27 = vmul.f32 -1.442695, %v1458_v20 }
 0x3c8   :  { %v3801_v46 = vmul.f32 -1.442695, %v1459_v34  ;;  %v3802_v31 = vmul.f32 -1.442695, %v1461_v23  ;;  %v5616_v34 = vld [vmem:[#allocation25_spill] sm:$0xff] }
 0x3c9   :  { %4316 = vpow2.f32 %v3800_v27  ;;  %v732_v27 = vadd.f32 %v5157_v44, %v3715_v33  ;;  %v5615_v44 = vld [vmem:[#allocation36_spill] sm:$0xff]  ;;  %v5617_v23 = vld [vmem:[#allocation37_spill] sm:$0xff] }
 0x3ca   :  { %4318 = vpow2.f32 %v3801_v46 }
 0x3cb   :  { %4320 = vpow2.f32 %v3802_v31 }
 0x3cc   :  { %4322 = vtanh.f32 %v1460_v38 }
 0x3d3   :  { %v4317_v56 = vpop.eup %4316 }
 0x3d4   :  { %v4319_v45 = vpop.eup %4318  ;;  %v1465_v35 = vadd.f32 1.0, %v4317_v56 }
 0x3d5   :  { %v1471_v29 = vadd.f32 1.0, %v4319_v45  ;;  %v4321_v37 = vpop.eup %4320 }
 0x3d6   :  { %4324 = vrcp.f32 %v1465_v35  ;;  %v4323_v41 = vpop.eup %4322  ;;  %v1478_v48 = vadd.f32 1.0, %v4321_v37 }
 0x3d7   :  { %4326 = vrcp.f32 %v1471_v29 }
 0x3d8   :  { %4328 = vrcp.f32 %v1478_v48 }
 0x3e0   :  { %v4325_v40 = vpop.eup %4324 }
 0x3e1   :  { %v4327_v46 = vpop.eup %4326  ;;  %v1482_v47 = vmul.f32 %v4325_v40, %v4323_v41 }
 0x3e2   :  { %v1481_v1 = vmul.f32 %v4327_v46, %v732_v27  ;;  %v4329_v26 = vpop.eup %4328 }
 0x3e4   :  { %v5211_v4 = vadd.f32 %v1482_v47, %v1481_v1 }
 0x3e6   :  { %4330 = vtanh.f32 %v5211_v4 }
 0x3f0   :  { %v4331_v24 = vpop.eup %4330 }
 0x3f1   :  { %v5214_v43 = vmul.f32 %v4331_v24, %v4329_v26 }
 0x3f3   :  { %v1494_v39 = vpack.c.bf16 %v5214_v43, %v5214_v43 }
 0x3f5   :  { %1720 = vmatmul.mubr.bf16.vlgmr.msra.gmra.mrb[24].mxu1 %v1494_v39  ;;  %1761 = vmatmul.mubr.bf16.vlgmr.msra.gmra.mrb[28].mxu0 %v1494_v39 }
 0x3f6   :  { %2026 = vmatpush1.bf16.msra.mxu1 %v4901_v50  ;;  %2067 = vmatpush1.bf16.msra.mxu0 %v5014_v6  ;;  %v1773_v50 = vld [vmem:[%s5584_s11] sm:$0xf] }
 0x3f7   :  { %2027 = vmatprep.subr.bf16.mxu1 %v4904_v51  ;;  %2068 = vmatprep.subr.bf16.mxu0 %v5017_v7  ;;  %v1778_v51 = vrot.slane %v1773_v50, %v4956_v3  ;;  %v1782_v7 = vrot.slane %v1773_v50, %v4962_v5  ;;  %v1790_v41 = vrot.slane %v1773_v50, %v5169_v30 }
 0x3f8   :  { %2057 = vmatprep.mubr.bf16.mxu1 %v5602_v42  ;;  %2098 = vmatprep.mubr.bf16.mxu0 %v5602_v42  ;;  %v1786_v40 = vrot.slane %v1773_v50, %v5166_v28 }
 0x3fa   :  { %2028 = vmatpush1.bf16.msra.mxu1 %v4908_v52  ;;  %2069 = vmatpush1.bf16.msra.mxu0 %v5021_v8 }
 0x3fb   :  { %2029 = vmatprep.subr.bf16.mxu1 %v4912_v53  ;;  %2070 = vmatprep.subr.bf16.mxu0 %v5025_v9 }
 0x3fe   :  { %2030 = vmatpush1.bf16.msra.mxu1 %v4917_v55  ;;  %2071 = vmatpush1.bf16.msra.mxu0 %v5028_v10 }
 0x3ff   :  { %2031 = vmatprep.subr.bf16.mxu1 %v4920_v57  ;;  %2072 = vmatprep.subr.bf16.mxu0 %v5031_v11 }
 0x402   :  { %2032 = vmatpush1.bf16.msra.mxu1 %v4924_v58  ;;  %2073 = vmatpush1.bf16.msra.mxu0 %v5035_v49 }
 0x403   :  { %2033 = vmatprep.subr.bf16.mxu1 %v4928_v59  ;;  %2074 = vmatprep.subr.bf16.mxu0 %v5039_v12 }
 0x406   :  { %2034 = vmatpush1.bf16.msra.mxu1 %v4933_v61  ;;  %2075 = vmatpush1.bf16.msra.mxu0 %v5042_v13 }
 0x407   :  { %2035 = vmatprep.subr.bf16.mxu1 %v4936_v62  ;;  %2076 = vmatprep.subr.bf16.mxu0 %v5045_v14 }
 0x40a   :  { %2036 = vmatpush1.bf16.msra.mxu1 %v4940_v63  ;;  %2077 = vmatpush1.bf16.msra.mxu0 %v5049_v54 }
 0x40b   :  { %2037 = vmatprep.subr.bf16.mxu1 %v4944_v0  ;;  %2078 = vmatprep.subr.bf16.mxu0 %v5053_v15 }
 0x40e   :  { %2038 = vmatpush1.bf16.msra.mxu1 %v4949_v2  ;;  %2079 = vmatpush1.bf16.msra.mxu0 %v5056_v16 }
 0x40f   :  { %2039 = vmatprep.subr.bf16.mxu1 %v5059_v17  ;;  %2080 = vmatprep.subr.bf16.mxu0 %v5061_v18 }
 0x412   :  { %2040 = vmatpush1.bf16.msra.mxu1 %v5063_v60  ;;  %2081 = vmatpush1.bf16.msra.mxu0 %v5069_v19 }
 0x4c8   :  { %v1721_v52 = vpop.f32.mrb[24].mxu1  ;;  %v1762_v6 = vpop.f32.mrb[28].mxu0 }
 0x4c9   :  { %v1769_v8 = vadd.f32 %v1721_v52, %v5094_v25  ;;  %v1771_v20 = vadd.f32 %v1762_v6, %v5615_v44  ;;  %v1723_v21 = vpop.f32.mrb[25].mxu1  ;;  %v1764_v32 = vpop.f32.mrb[29].mxu0 }
 0x4ca   :  { %v1770_v22 = vadd.f32 %v1723_v21, %v5616_v34  ;;  %v1772_v36 = vadd.f32 %v1764_v32, %v5617_v23  ;;  %v1725_v31 = vpop.f32.mrb[26].mxu1  ;;  %v1766_v38 = vpop.f32.mrb[30].mxu0  ;;  %v5271_v34 = vld [vmem:[#allocation15 + $0x4] ss:$16 sps:$4 sm:$0xff]   ;;  %v5277_v23 = vld [vmem:[#allocation15 + $0x8] ss:$16 sps:$4 sm:$0xff]  }
 0x4cb   :  { %v1795_v56 = vadd.f32 %v1778_v51, %v1769_v8  ;;  %v1726_v45 = vpop.f32.mrb[27].mxu1  ;;  %v1767_v35 = vpop.f32.mrb[31].mxu0  ;;  %v1797_v46 = vadd.f32 %v1786_v40, %v1771_v20  ;;  %2363 = vmatprep.subr.bf16.mxu1 %v5271_v34  ;;  %v5285_v31 = vld [vmem:[#allocation15 + $0x2c] ss:$16 sps:$4 sm:$0xff]   ;;  %v5287_v38 = vld [vmem:[#allocation15 + $0x20] ss:$16 sps:$4 sm:$0xff]  }
 0x4cc   :  { %v1796_v29 = vadd.f32 %v1782_v7, %v1770_v22  ;;  %v1798_v25 = vadd.f32 %v1790_v41, %v1772_v36  ;;  %v5275_v22 = vld [vmem:[#allocation15] ss:$16 sps:$4 sm:$0xff]   ;;  %v5283_v36 = vld [vmem:[#allocation15 + $0x24] ss:$16 sps:$4 sm:$0xff]  }
 0x4cd   :  { %v3835_v33 = vmul.f32 -1.442695, %v1795_v56  ;;  %v5289_v56 = vld [vmem:[#allocation15 + $0x28] ss:$16 sps:$4 sm:$0xff]  }
 0x4ce   :  { %v3836_v37 = vmul.f32 -1.442695, %v1796_v29  ;;  %v3837_v27 = vmul.f32 -1.442695, %v1798_v25 }
 0x4cf   :  { %4332 = vpow2.f32 %v3835_v33 }
 0x4d0   :  { %4334 = vpow2.f32 %v3836_v37 }
 0x4d1   :  { %4336 = vpow2.f32 %v3837_v27 }
 0x4d2   :  { %4338 = vtanh.f32 %v1797_v46 }
 0x4d9   :  { %v4333_v47 = vpop.eup %4332 }
 0x4da   :  { %v4335_v48 = vpop.eup %4334  ;;  %v1802_v1 = vadd.f32 1.0, %v4333_v47 }
 0x4db   :  { %v1808_v26 = vadd.f32 1.0, %v4335_v48  ;;  %v4337_v24 = vpop.eup %4336 }
 0x4dc   :  { %4340 = vrcp.f32 %v1802_v1  ;;  %v4339_v39 = vpop.eup %4338  ;;  %v1815_v7 = vadd.f32 1.0, %v4337_v24 }
 0x4dd   :  { %4342 = vrcp.f32 %v1808_v26 }
 0x4de   :  { %4344 = vrcp.f32 %v1815_v7 }
 0x4e6   :  { %v4341_v51 = vpop.eup %4340 }
 0x4e7   :  { %v4343_v52 = vpop.eup %4342  ;;  %v1819_v6 = vmul.f32 %v4341_v51, %v4339_v39 }
 0x4e8   :  { %v1818_v8 = vmul.f32 %v4343_v52, %v5211_v4  ;;  %v4345_v50 = vpop.eup %4344  ;;  %v5273_v4 = vld [vmem:[#allocation15 + $0xc] ss:$16 sps:$4 sm:$0xff]  }
 0x4e9   :  { %2404 = vmatprep.subr.bf16.mxu0 %v5273_v4 }
 0x4ea   :  { %v5262_v44 = vadd.f32 %v1819_v6, %v1818_v8  ;;  %v5348_v8 = vld [vmem:[#allocation15 + $0x44] ss:$16 sps:$4 sm:$0xff]  }
 0x4ec   :  { %4346 = vtanh.f32 %v5262_v44 }
 0x4f6   :  { %v4347_v20 = vpop.eup %4346 }
 0x4f7   :  { %v5265_v21 = vmul.f32 %v4347_v20, %v4345_v50  ;;  %v5352_v50 = vld [vmem:[#allocation15 + $0x40] ss:$16 sps:$4 sm:$0xff]   ;;  %v5354_v20 = vld [vmem:[#allocation15 + $0x48] ss:$16 sps:$4 sm:$0xff]  }
 0x4f9   :  { %v1832_v32 = vpack.c.bf16 %v5265_v21, %v5265_v21 }
 0x4fb   :  { %2058 = vmatmul.mubr.bf16.vlgmr.msra.gmra.mrb[28].mxu1 %v1832_v32  ;;  %2099 = vmatmul.mubr.bf16.vlgmr.msra.gmra.mrb[32].mxu0 %v1832_v32  ;;  %v5360_v32 = vld [vmem:[#allocation15 + $0x64] ss:$16 sps:$4 sm:$0xff]  }
 0x4fc   :  { %2395 = vmatprep.mubr.bf16.mxu1 %v5602_v42  ;;  %2436 = vmatprep.mubr.bf16.mxu0 %v5602_v42 }
 0x4fd   :  { %2364 = vmatpush1.bf16.msra.mxu1 %v5275_v22  ;;  %2405 = vmatpush1.bf16.msra.mxu0 %v5277_v23 }
 0x4fe   :  { %2365 = vmatprep.subr.bf16.mxu1 %v5283_v36  ;;  %2406 = vmatprep.subr.bf16.mxu0 %v5285_v31 }
 0x501   :  { %2366 = vmatpush1.bf16.msra.mxu1 %v5287_v38  ;;  %2407 = vmatpush1.bf16.msra.mxu0 %v5289_v56 }
 0x502   :  { %2367 = vmatprep.subr.bf16.mxu1 %v4912_v53  ;;  %2408 = vmatprep.subr.bf16.mxu0 %v5025_v9  ;;  %v2111_v53 = vld [vmem:[%s5584_s11] sm:$0xf] }
 0x503   :  { %v2124_v35 = vrot.slane %v2111_v53, %v5166_v28 }
 0x505   :  { %2368 = vmatpush1.bf16.msra.mxu1 %v4917_v55  ;;  %2409 = vmatpush1.bf16.msra.mxu0 %v5028_v10  ;;  %v2116_v55 = vrot.slane %v2111_v53, %v4956_v3  ;;  %v5620_v10 = vld [vmem:[#allocation27_spill] sm:$0xff] }
 0x506   :  { %2369 = vmatprep.subr.bf16.mxu1 %v4920_v57  ;;  %2410 = vmatprep.subr.bf16.mxu0 %v5031_v11 }
 0x509   :  { %2370 = vmatpush1.bf16.msra.mxu1 %v4924_v58  ;;  %2411 = vmatpush1.bf16.msra.mxu0 %v5035_v49  ;;  %v5621_v49 = vld [vmem:[#allocation39_spill] sm:$0xff] }
 0x50a   :  { %2371 = vmatprep.subr.bf16.mxu1 %v4928_v59  ;;  %2412 = vmatprep.subr.bf16.mxu0 %v5039_v12  ;;  %v2120_v59 = vrot.slane %v2111_v53, %v4962_v5 }
 0x50d   :  { %2372 = vmatpush1.bf16.msra.mxu1 %v4933_v61  ;;  %2413 = vmatpush1.bf16.msra.mxu0 %v5042_v13  ;;  %v5618_v61 = vld [vmem:[#allocation26_spill] sm:$0xff] }
 0x50e   :  { %2373 = vmatprep.subr.bf16.mxu1 %v4936_v62  ;;  %2414 = vmatprep.subr.bf16.mxu0 %v5045_v14 }
 0x511   :  { %2374 = vmatpush1.bf16.msra.mxu1 %v4940_v63  ;;  %2415 = vmatpush1.bf16.msra.mxu0 %v5049_v54  ;;  %v5619_v63 = vld [vmem:[#allocation38_spill] sm:$0xff] }
 0x512   :  { %2375 = vmatprep.subr.bf16.mxu1 %v4944_v0  ;;  %2416 = vmatprep.subr.bf16.mxu0 %v5053_v15 }
 0x515   :  { %2376 = vmatpush1.bf16.msra.mxu1 %v4949_v2  ;;  %2417 = vmatpush1.bf16.msra.mxu0 %v5056_v16 }
 0x516   :  { %2377 = vmatprep.subr.bf16.mxu1 %v5059_v17  ;;  %2418 = vmatprep.subr.bf16.mxu0 %v5061_v18 }
 0x519   :  { %2378 = vmatpush1.bf16.msra.mxu1 %v5063_v60  ;;  %2419 = vmatpush1.bf16.msra.mxu0 %v5069_v19  ;;  %v2128_v19 = vrot.slane %v2111_v53, %v5169_v30  ;;  %v5362_v53 = vld [vmem:[#allocation15 + $0x6c] ss:$16 sps:$4 sm:$0xff]  }
 0x51a   :  { %2701 = vmatprep.subr.bf16.mxu1 %v5271_v34  ;;  %2742 = vmatprep.subr.bf16.mxu0 %v5273_v4 }
 0x5ce   :  { %v2059_v57 = vpop.f32.mrb[28].mxu1  ;;  %v2100_v58 = vpop.f32.mrb[32].mxu0 }
 0x5cf   :  { %v2107_v62 = vadd.f32 %v2059_v57, %v5618_v61  ;;  %v2109_v0 = vadd.f32 %v2100_v58, %v5619_v63  ;;  %v2061_v2 = vpop.f32.mrb[29].mxu1  ;;  %v2102_v9 = vpop.f32.mrb[33].mxu0  ;;  %v5366_v57 = vld [vmem:[#allocation15 + $0x68] ss:$16 sps:$4 sm:$0xff]   ;;  %v5372_v58 = vld [vmem:[#allocation15 + $0x80] ss:$16 sps:$4 sm:$0xff]  }
 0x5d0   :  { %v2108_v11 = vadd.f32 %v2061_v2, %v5620_v10  ;;  %v2110_v12 = vadd.f32 %v2102_v9, %v5621_v49  ;;  %v2063_v13 = vpop.f32.mrb[30].mxu1  ;;  %v2104_v14 = vpop.f32.mrb[34].mxu0  ;;  %v5376_v61 = vld [vmem:[#allocation15 + $0x88] ss:$16 sps:$4 sm:$0xff]   ;;  %v5380_v63 = vld [vmem:[#allocation15 + $0xa4] ss:$16 sps:$4 sm:$0xff]  }
 0x5d1   :  { %v2133_v54 = vadd.f32 %v2116_v55, %v2107_v62  ;;  %v2064_v15 = vpop.f32.mrb[31].mxu1  ;;  %v2105_v16 = vpop.f32.mrb[35].mxu0  ;;  %v2135_v33 = vadd.f32 %v2124_v35, %v2109_v0  ;;  %v5364_v55 = vld [vmem:[#allocation15 + $0x60] ss:$16 sps:$4 sm:$0xff]   ;;  %v5378_v62 = vld [vmem:[#allocation15 + $0x8c] ss:$16 sps:$4 sm:$0xff]  }
 0x5d2   :  { %v2134_v17 = vadd.f32 %v2120_v59, %v2108_v11  ;;  %v2136_v45 = vadd.f32 %v2128_v19, %v2110_v12  ;;  %v5374_v59 = vld [vmem:[#allocation15 + $0x84] ss:$16 sps:$4 sm:$0xff]   ;;  %v5383_v0 = vld [vmem:[#allocation15 + $0xac] ss:$16 sps:$4 sm:$0xff]   ;;  %v5387_v2 = vld [vmem:[#allocation15 + $0xa0] ss:$16 sps:$4 sm:$0xff]  }
 0x5d3   :  { %v3870_v18 = vmul.f32 -1.442695, %v2133_v54  ;;  %v5391_v9 = vld [vmem:[#allocation15 + $0xa8] ss:$16 sps:$4 sm:$0xff]   ;;  %v5393_v10 = vld [vmem:[#allocation15 + $0xc4] ss:$16 sps:$4 sm:$0xff]  }
 0x5d4   :  { %v3871_v60 = vmul.f32 -1.442695, %v2134_v17  ;;  %v3872_v29 = vmul.f32 -1.442695, %v2136_v45  ;;  %v5396_v11 = vld [vmem:[#allocation15 + $0xcc] ss:$16 sps:$4 sm:$0xff]  }
 0x5d5   :  { %4348 = vpow2.f32 %v3870_v18  ;;  %v5399_v49 = vld [vmem:[#allocation15 + $0xc0] ss:$16 sps:$4 sm:$0xff]   ;;  %v5403_v12 = vld [vmem:[#allocation15 + $0xc8] ss:$16 sps:$4 sm:$0xff]   ;;  %v5405_v13 = vld [vmem:[#allocation15 + $0xe4] ss:$16 sps:$4 sm:$0xff]  }
 0x5d6   :  { %4350 = vpow2.f32 %v3871_v60  ;;  %v5408_v14 = vld [vmem:[#allocation15 + $0xec] ss:$16 sps:$4 sm:$0xff]   ;;  %v5411_v54 = vld [vmem:[#allocation15 + $0xe0] ss:$16 sps:$4 sm:$0xff]   ;;  %v5415_v15 = vld [vmem:[#allocation15 + $0xe8] ss:$16 sps:$4 sm:$0xff]  }
 0x5d7   :  { %4352 = vpow2.f32 %v3872_v29  ;;  %v2449_v16 = vld [vmem:[%s5584_s11] sm:$0xf]  ;;  %v5623_v45 = vld [vmem:[#allocation28_spill] sm:$0xff] }
 0x5d8   :  { %4354 = vtanh.f32 %v2135_v33  ;;  %v2454_v17 = vrot.slane %v2449_v16, %v4956_v3  ;;  %v2458_v19 = vrot.slane %v2449_v16, %v4962_v5  ;;  %v5624_v29 = vld [vmem:[#allocation40_spill] sm:$0xff] }
 0x5df   :  { %v4349_v37 = vpop.eup %4348 }
 0x5e0   :  { %v4351_v41 = vpop.eup %4350  ;;  %v2140_v25 = vadd.f32 1.0, %v4349_v37 }
 0x5e1   :  { %v2146_v40 = vadd.f32 1.0, %v4351_v41  ;;  %v4353_v27 = vpop.eup %4352 }
 0x5e2   :  { %4356 = vrcp.f32 %v2140_v25  ;;  %v4355_v46 = vpop.eup %4354  ;;  %v2153_v26 = vadd.f32 1.0, %v4353_v27  ;;  %v5625_v25 = vld [vmem:[#allocation29_spill] sm:$0xff] }
 0x5e3   :  { %4358 = vrcp.f32 %v2146_v40  ;;  %v5626_v27 = vld [vmem:[#allocation41_spill] sm:$0xff] }
 0x5e4   :  { %4360 = vrcp.f32 %v2153_v26 }
 0x5ec   :  { %v4357_v47 = vpop.eup %4356 }
 0x5ed   :  { %v4359_v48 = vpop.eup %4358  ;;  %v2157_v1 = vmul.f32 %v4357_v47, %v4355_v46 }
 0x5ee   :  { %v2156_v24 = vmul.f32 %v4359_v48, %v5262_v44  ;;  %v4361_v51 = vpop.eup %4360  ;;  %v5350_v44 = vld [vmem:[#allocation15 + $0x4c] ss:$16 sps:$4 sm:$0xff]  }
 0x5f0   :  { %v5333_v39 = vadd.f32 %v2157_v1, %v2156_v24 }
 0x5f2   :  { %4362 = vtanh.f32 %v5333_v39 }
 0x5fc   :  { %v4363_v52 = vpop.eup %4362 }
 0x5fd   :  { %v5336_v6 = vmul.f32 %v4363_v52, %v4361_v51 }
 0x5ff   :  { %5622 = vst [vmem:[#allocation36_spill] sm:$0xff] %v5336_v6  ;;  %v2170_v7 = vpack.c.bf16 %v5336_v6, %v5336_v6  ;;  %v2466_v6 = vrot.slane %v2449_v16, %v5169_v30 }
 0x601   :  { %2396 = vmatmul.mubr.bf16.vlgmr.msra.gmra.mrb[32].mxu1 %v2170_v7  ;;  %2437 = vmatmul.mubr.bf16.vlgmr.msra.gmra.mrb[36].mxu0 %v2170_v7 }
 0x602   :  { %2702 = vmatpush1.bf16.msra.mxu1 %v5275_v22  ;;  %2743 = vmatpush1.bf16.msra.mxu0 %v5277_v23 }
 0x603   :  { %2703 = vmatprep.subr.bf16.mxu1 %v5283_v36  ;;  %2744 = vmatprep.subr.bf16.mxu0 %v5285_v31 }
 0x604   :  { %2733 = vmatprep.mubr.bf16.mxu1 %v5602_v42  ;;  %2774 = vmatprep.mubr.bf16.mxu0 %v5602_v42 }
 0x606   :  { %2704 = vmatpush1.bf16.msra.mxu1 %v5287_v38  ;;  %2745 = vmatpush1.bf16.msra.mxu0 %v5289_v56 }
 0x607   :  { %2705 = vmatprep.subr.bf16.mxu1 %v5348_v8  ;;  %2746 = vmatprep.subr.bf16.mxu0 %v5350_v44 }
 0x60a   :  { %2706 = vmatpush1.bf16.msra.mxu1 %v5352_v50  ;;  %2747 = vmatpush1.bf16.msra.mxu0 %v5354_v20 }
 0x60b   :  { %2707 = vmatprep.subr.bf16.mxu1 %v5360_v32  ;;  %2748 = vmatprep.subr.bf16.mxu0 %v5362_v53 }
 0x60e   :  { %2708 = vmatpush1.bf16.msra.mxu1 %v5364_v55  ;;  %2749 = vmatpush1.bf16.msra.mxu0 %v5366_v57 }
 0x60f   :  { %2709 = vmatprep.subr.bf16.mxu1 %v5374_v59  ;;  %2750 = vmatprep.subr.bf16.mxu0 %v5378_v62 }
 0x612   :  { %2710 = vmatpush1.bf16.msra.mxu1 %v5372_v58  ;;  %2751 = vmatpush1.bf16.msra.mxu0 %v5376_v61 }
 0x613   :  { %2711 = vmatprep.subr.bf16.mxu1 %v5380_v63  ;;  %2752 = vmatprep.subr.bf16.mxu0 %v5383_v0 }
 0x616   :  { %2712 = vmatpush1.bf16.msra.mxu1 %v5387_v2  ;;  %2753 = vmatpush1.bf16.msra.mxu0 %v5391_v9 }
 0x617   :  { %2713 = vmatprep.subr.bf16.mxu1 %v5393_v10  ;;  %2754 = vmatprep.subr.bf16.mxu0 %v5396_v11 }
 0x61a   :  { %2714 = vmatpush1.bf16.msra.mxu1 %v5399_v49  ;;  %2755 = vmatpush1.bf16.msra.mxu0 %v5403_v12 }
 0x61b   :  { %2715 = vmatprep.subr.bf16.mxu1 %v5405_v13  ;;  %2756 = vmatprep.subr.bf16.mxu0 %v5408_v14 }
 0x61e   :  { %2716 = vmatpush1.bf16.msra.mxu1 %v5411_v54  ;;  %2757 = vmatpush1.bf16.msra.mxu0 %v5415_v15 }
 0x61f   :  { %3039 = vmatprep.subr.bf16.mxu1 %v5271_v34  ;;  %3080 = vmatprep.subr.bf16.mxu0 %v5273_v4 }
 0x6d4   :  { %v2397_v18 = vpop.f32.mrb[32].mxu1  ;;  %v2438_v60 = vpop.f32.mrb[36].mxu0 }
 0x6d5   :  { %v2445_v35 = vadd.f32 %v2397_v18, %v5623_v45  ;;  %v2447_v33 = vadd.f32 %v2438_v60, %v5624_v29  ;;  %v2399_v37 = vpop.f32.mrb[33].mxu1  ;;  %v2440_v41 = vpop.f32.mrb[37].mxu0  ;;  %v2462_v60 = vrot.slane %v2449_v16, %v5166_v28 }
 0x6d6   :  { %v2446_v40 = vadd.f32 %v2399_v37, %v5625_v25  ;;  %v2448_v46 = vadd.f32 %v2440_v41, %v5626_v27  ;;  %v2401_v47 = vpop.f32.mrb[34].mxu1  ;;  %v2442_v48 = vpop.f32.mrb[38].mxu0 }
 0x6d7   :  { %v2471_v1 = vadd.f32 %v2454_v17, %v2445_v35  ;;  %v2402_v26 = vpop.f32.mrb[35].mxu1  ;;  %v2443_v24 = vpop.f32.mrb[39].mxu0  ;;  %v2473_v29 = vadd.f32 %v2462_v60, %v2447_v33 }
 0x6d8   :  { %v2472_v51 = vadd.f32 %v2458_v19, %v2446_v40  ;;  %v2474_v18 = vadd.f32 %v2466_v6, %v2448_v46 }
 0x6d9   :  { %v3905_v52 = vmul.f32 -1.442695, %v2471_v1 }
 0x6da   :  { %v3906_v7 = vmul.f32 -1.442695, %v2472_v51  ;;  %v3907_v45 = vmul.f32 -1.442695, %v2474_v18  ;;  %v5627_v18 = vld [vmem:[#allocation30_spill] sm:$0xff] }
 0x6db   :  { %4364 = vpow2.f32 %v3905_v52 }
 0x6dc   :  { %4366 = vpow2.f32 %v3906_v7 }
 0x6dd   :  { %4368 = vpow2.f32 %v3907_v45  ;;  %v5628_v45 = vld [vmem:[#allocation42_spill] sm:$0xff] }
 0x6de   :  { %4370 = vtanh.f32 %v2473_v29 }
 0x6e5   :  { %v4365_v37 = vpop.eup %4364 }
 0x6e6   :  { %v4367_v25 = vpop.eup %4366  ;;  %v2478_v41 = vadd.f32 1.0, %v4365_v37 }
 0x6e7   :  { %v2484_v17 = vadd.f32 1.0, %v4367_v25  ;;  %v4369_v19 = vpop.eup %4368 }
 0x6e8   :  { %4372 = vrcp.f32 %v2478_v41  ;;  %v4371_v35 = vpop.eup %4370  ;;  %v2491_v48 = vadd.f32 1.0, %v4369_v19  ;;  %v5629_v41 = vld [vmem:[#allocation31_spill] sm:$0xff] }
 0x6e9   :  { %4374 = vrcp.f32 %v2484_v17  ;;  %v5630_v17 = vld [vmem:[#allocation43_spill] sm:$0xff] }
 0x6ea   :  { %4376 = vrcp.f32 %v2491_v48 }
 0x6f2   :  { %v4373_v40 = vpop.eup %4372 }
 0x6f3   :  { %v4375_v27 = vpop.eup %4374  ;;  %v2495_v47 = vmul.f32 %v4373_v40, %v4371_v35 }
 0x6f4   :  { %v2494_v6 = vmul.f32 %v4375_v27, %v5333_v39  ;;  %v4377_v16 = vpop.eup %4376  ;;  %v2787_v39 = vld [vmem:[%s5584_s11] sm:$0xf] }
 0x6f5   :  { %v2792_v24 = vrot.slane %v2787_v39, %v4956_v3  ;;  %v2796_v7 = vrot.slane %v2787_v39, %v4962_v5 }
 0x6f6   :  { %v5434_v46 = vadd.f32 %v2495_v47, %v2494_v6 }
 0x6f8   :  { %4378 = vtanh.f32 %v5434_v46 }
 0x702   :  { %v4379_v33 = vpop.eup %4378 }
 0x703   :  { %v5437_v1 = vmul.f32 %v4379_v33, %v4377_v16  ;;  %v2804_v33 = vrot.slane %v2787_v39, %v5169_v30 }
 0x705   :  { %v2508_v26 = vpack.c.bf16 %v5437_v1, %v5437_v1 }
 0x707   :  { %2734 = vmatmul.mubr.bf16.vlgmr.msra.gmra.mrb[36].mxu1 %v2508_v26  ;;  %2775 = vmatmul.mubr.bf16.vlgmr.msra.gmra.mrb[40].mxu0 %v2508_v26 }
 0x708   :  { %3040 = vmatpush1.bf16.msra.mxu1 %v5275_v22  ;;  %3081 = vmatpush1.bf16.msra.mxu0 %v5277_v23 }
 0x709   :  { %3041 = vmatprep.subr.bf16.mxu1 %v5283_v36  ;;  %3082 = vmatprep.subr.bf16.mxu0 %v5285_v31 }
 0x70a   :  { %3071 = vmatprep.mubr.bf16.mxu1 %v5602_v42  ;;  %3112 = vmatprep.mubr.bf16.mxu0 %v5602_v42 }
 0x70c   :  { %3042 = vmatpush1.bf16.msra.mxu1 %v5287_v38  ;;  %3083 = vmatpush1.bf16.msra.mxu0 %v5289_v56 }
 0x70d   :  { %3043 = vmatprep.subr.bf16.mxu1 %v5348_v8  ;;  %3084 = vmatprep.subr.bf16.mxu0 %v5350_v44 }
 0x710   :  { %3044 = vmatpush1.bf16.msra.mxu1 %v5352_v50  ;;  %3085 = vmatpush1.bf16.msra.mxu0 %v5354_v20 }
 0x711   :  { %3045 = vmatprep.subr.bf16.mxu1 %v5360_v32  ;;  %3086 = vmatprep.subr.bf16.mxu0 %v5362_v53 }
 0x714   :  { %3046 = vmatpush1.bf16.msra.mxu1 %v5364_v55  ;;  %3087 = vmatpush1.bf16.msra.mxu0 %v5366_v57 }
 0x715   :  { %3047 = vmatprep.subr.bf16.mxu1 %v5374_v59  ;;  %3088 = vmatprep.subr.bf16.mxu0 %v5378_v62 }
 0x718   :  { %3048 = vmatpush1.bf16.msra.mxu1 %v5372_v58  ;;  %3089 = vmatpush1.bf16.msra.mxu0 %v5376_v61 }
 0x719   :  { %3049 = vmatprep.subr.bf16.mxu1 %v5380_v63  ;;  %3090 = vmatprep.subr.bf16.mxu0 %v5383_v0 }
 0x71c   :  { %3050 = vmatpush1.bf16.msra.mxu1 %v5387_v2  ;;  %3091 = vmatpush1.bf16.msra.mxu0 %v5391_v9 }
 0x71d   :  { %3051 = vmatprep.subr.bf16.mxu1 %v5393_v10  ;;  %3092 = vmatprep.subr.bf16.mxu0 %v5396_v11 }
 0x720   :  { %3052 = vmatpush1.bf16.msra.mxu1 %v5399_v49  ;;  %3093 = vmatpush1.bf16.msra.mxu0 %v5403_v12 }
 0x721   :  { %3053 = vmatprep.subr.bf16.mxu1 %v5405_v13  ;;  %3094 = vmatprep.subr.bf16.mxu0 %v5408_v14 }
 0x724   :  { %3054 = vmatpush1.bf16.msra.mxu1 %v5411_v54  ;;  %3095 = vmatpush1.bf16.msra.mxu0 %v5415_v15 }
 0x725   :  { %3377 = vmatprep.subr.bf16.mxu1 %v5271_v34  ;;  %3418 = vmatprep.subr.bf16.mxu0 %v5273_v4 }
 0x7da   :  { %v2735_v51 = vpop.f32.mrb[36].mxu1  ;;  %v2776_v52 = vpop.f32.mrb[40].mxu0 }
 0x7db   :  { %v2783_v60 = vadd.f32 %v2735_v51, %v5627_v18  ;;  %v2785_v29 = vadd.f32 %v2776_v52, %v5628_v45  ;;  %v2737_v37 = vpop.f32.mrb[37].mxu1  ;;  %v2778_v25 = vpop.f32.mrb[41].mxu0  ;;  %v2800_v51 = vrot.slane %v2787_v39, %v5166_v28 }
 0x7dc   :  { %v2784_v34 = vadd.f32 %v2737_v37, %v5629_v41  ;;  %v2786_v4 = vadd.f32 %v2778_v25, %v5630_v17  ;;  %v2739_v19 = vpop.f32.mrb[38].mxu1  ;;  %v2780_v35 = vpop.f32.mrb[42].mxu0 }
 0x7dd   :  { %v2809_v40 = vadd.f32 %v2792_v24, %v2783_v60  ;;  %v2740_v27 = vpop.f32.mrb[39].mxu1  ;;  %v2781_v47 = vpop.f32.mrb[43].mxu0  ;;  %v2811_v18 = vadd.f32 %v2800_v51, %v2785_v29 }
 0x7de   :  { %v2810_v48 = vadd.f32 %v2796_v7, %v2784_v34  ;;  %v2812_v26 = vadd.f32 %v2804_v33, %v2786_v4 }
 0x7df   :  { %v3940_v6 = vmul.f32 -1.442695, %v2809_v40 }
 0x7e0   :  { %v3941_v16 = vmul.f32 -1.442695, %v2810_v48  ;;  %v3942_v52 = vmul.f32 -1.442695, %v2812_v26 }
 0x7e1   :  { %4380 = vpow2.f32 %v3940_v6 }
 0x7e2   :  { %4382 = vpow2.f32 %v3941_v16 }
 0x7e3   :  { %4384 = vpow2.f32 %v3942_v52 }
 0x7e4   :  { %4386 = vtanh.f32 %v2811_v18 }
 0x7eb   :  { %v4381_v45 = vpop.eup %4380 }
 0x7ec   :  { %v4383_v37 = vpop.eup %4382  ;;  %v2816_v25 = vadd.f32 1.0, %v4381_v45 }
 0x7ed   :  { %v2822_v24 = vadd.f32 1.0, %v4383_v37  ;;  %v4385_v7 = vpop.eup %4384 }
 0x7ee   :  { %4388 = vrcp.f32 %v2816_v25  ;;  %v4387_v60 = vpop.eup %4386  ;;  %v2829_v19 = vadd.f32 1.0, %v4385_v7  ;;  %v4309_v7 = vld [vmem:[#allocation16 + $0x8] sm:$0xff]  }
 0x7ef   :  { %4390 = vrcp.f32 %v2822_v24 }
 0x7f0   :  { %4392 = vrcp.f32 %v2829_v19  ;;  %v4313_v19 = vld [vmem:[#allocation16 + $0x28] sm:$0xff]  }
 0x7f8   :  { %v4389_v41 = vpop.eup %4388 }
 0x7f9   :  { %v4391_v34 = vpop.eup %4390  ;;  %v2833_v17 = vmul.f32 %v4389_v41, %v4387_v60  ;;  %v3522_v60 = vpack.c.bf16 %v5265_v21, %v5214_v43  ;;  %v4310_v41 = vld [vmem:[#allocation16 + $0x10] sm:$0xff]   ;;  %v4315_v43 = vld [vmem:[#allocation16 + $0x38] sm:$0xff]  }
 0x7fa   :  { %v2832_v4 = vmul.f32 %v4391_v34, %v5434_v46  ;;  %v4393_v39 = vpop.eup %4392  ;;  %v4311_v34 = vld [vmem:[#allocation16 + $0x18] sm:$0xff]   ;;  %v5635_v21 = vld [vmem:[#allocation36_spill] sm:$0xff] }
 0x7fc   :  { %v5487_v35 = vadd.f32 %v2833_v17, %v2832_v4  ;;  %v4312_v17 = vld [vmem:[#allocation16 + $0x20] sm:$0xff]   ;;  %v4314_v4 = vld [vmem:[#allocation16 + $0x30] sm:$0xff]  }
 0x7fe   :  { %4394 = vtanh.f32 %v5487_v35 }
 0x808   :  { %v4395_v29 = vpop.eup %4394 }
 0x809   :  { %v5490_v40 = vmul.f32 %v4395_v29, %v4393_v39  ;;  %v3463_v29 = vld [vmem:[%s5584_s11] sm:$0xf] }
 0x80b   :  { %v2846_v27 = vpack.c.bf16 %v5490_v40, %v5490_v40 }
 0x80d   :  { %3072 = vmatmul.mubr.bf16.vlgmr.msra.gmra.mrb[40].mxu1 %v2846_v27  ;;  %3113 = vmatmul.mubr.bf16.vlgmr.msra.gmra.mrb[44].mxu0 %v2846_v27  ;;  %v3468_v27 = vrot.slane %v3463_v29, %v4956_v3 }
 0x80e   :  { %3378 = vmatpush1.bf16.msra.mxu1 %v5275_v22  ;;  %3419 = vmatpush1.bf16.msra.mxu0 %v5277_v23  ;;  %v3125_v22 = vld [vmem:[%s5584_s11] sm:$0xf] }
 0x80f   :  { %3379 = vmatprep.subr.bf16.mxu1 %v5283_v36  ;;  %3420 = vmatprep.subr.bf16.mxu0 %v5285_v31  ;;  %v3130_v23 = vrot.slane %v3125_v22, %v4956_v3 }
 0x810   :  { %3409 = vmatprep.mubr.bf16.mxu1 %v5602_v42  ;;  %3450 = vmatprep.mubr.bf16.mxu0 %v5602_v42  ;;  %v4308_v42 = vld [vmem:[#allocation16] sm:$0xff]  }
 0x812   :  { %3380 = vmatpush1.bf16.msra.mxu1 %v5287_v38  ;;  %3421 = vmatpush1.bf16.msra.mxu0 %v5289_v56  ;;  %v3134_v38 = vrot.slane %v3125_v22, %v4962_v5  ;;  %v5631_v56 = vld [vmem:[#allocation32_spill] sm:$0xff] }
 0x813   :  { %3381 = vmatprep.subr.bf16.mxu1 %v5348_v8  ;;  %3422 = vmatprep.subr.bf16.mxu0 %v5350_v44  ;;  %v5632_v44 = vld [vmem:[#allocation44_spill] sm:$0xff] }
 0x816   :  { %3382 = vmatpush1.bf16.msra.mxu1 %v5352_v50  ;;  %3423 = vmatpush1.bf16.msra.mxu0 %v5354_v20 }
 0x817   :  { %3383 = vmatprep.subr.bf16.mxu1 %v5360_v32  ;;  %3424 = vmatprep.subr.bf16.mxu0 %v5362_v53  ;;  %v5633_v53 = vld [vmem:[#allocation33_spill] sm:$0xff] }
 0x81a   :  { %3384 = vmatpush1.bf16.msra.mxu1 %v5364_v55  ;;  %3425 = vmatpush1.bf16.msra.mxu0 %v5366_v57  ;;  %v5634_v57 = vld [vmem:[#allocation45_spill] sm:$0xff] }
 0x81b   :  { %3385 = vmatprep.subr.bf16.mxu1 %v5374_v59  ;;  %3426 = vmatprep.subr.bf16.mxu0 %v5378_v62 }
 0x81e   :  { %3386 = vmatpush1.bf16.msra.mxu1 %v5372_v58  ;;  %3427 = vmatpush1.bf16.msra.mxu0 %v5376_v61 }
 0x81f   :  { %3387 = vmatprep.subr.bf16.mxu1 %v5380_v63  ;;  %3428 = vmatprep.subr.bf16.mxu0 %v5383_v0 }
 0x822   :  { %3388 = vmatpush1.bf16.msra.mxu1 %v5387_v2  ;;  %3429 = vmatpush1.bf16.msra.mxu0 %v5391_v9 }
 0x823   :  { %3389 = vmatprep.subr.bf16.mxu1 %v5393_v10  ;;  %3430 = vmatprep.subr.bf16.mxu0 %v5396_v11  ;;  %v3142_v11 = vrot.slane %v3125_v22, %v5169_v30 }
 0x826   :  { %3390 = vmatpush1.bf16.msra.mxu1 %v5399_v49  ;;  %3431 = vmatpush1.bf16.msra.mxu0 %v5403_v12  ;;  %v3138_v12 = vrot.slane %v3125_v22, %v5166_v28 }
 0x827   :  { %3391 = vmatprep.subr.bf16.mxu1 %v5405_v13  ;;  %3432 = vmatprep.subr.bf16.mxu0 %v5408_v14 }
 0x82a   :  { %3392 = vmatpush1.bf16.msra.mxu1 %v5411_v54  ;;  %3433 = vmatpush1.bf16.msra.mxu0 %v5415_v15 }
 0x82b   :  { %4078 = vmatprep.subr.bf16.mxu1 %v4308_v42 }
 0x8e0   :  { %v3073_v36 = vpop.f32.mrb[40].mxu1  ;;  %v3114_v31 = vpop.f32.mrb[44].mxu0 }
 0x8e1   :  { %v3121_v8 = vadd.f32 %v3073_v36, %v5631_v56  ;;  %v3123_v50 = vadd.f32 %v3114_v31, %v5632_v44  ;;  %v3075_v20 = vpop.f32.mrb[41].mxu1  ;;  %v3116_v32 = vpop.f32.mrb[45].mxu0  ;;  %v5636_v36 = vld [vmem:[#allocation34_spill] sm:$0xff]  ;;  %v5638_v44 = vld [vmem:[#allocation35_spill] sm:$0xff] }
 0x8e2   :  { %v3122_v55 = vadd.f32 %v3075_v20, %v5633_v53  ;;  %v3124_v58 = vadd.f32 %v3116_v32, %v5634_v57  ;;  %v3077_v59 = vpop.f32.mrb[42].mxu1  ;;  %v3118_v61 = vpop.f32.mrb[46].mxu0 }
 0x8e3   :  { %v3147_v62 = vadd.f32 %v3130_v23, %v3121_v8  ;;  %v3078_v63 = vpop.f32.mrb[43].mxu1  ;;  %v3119_v0 = vpop.f32.mrb[47].mxu0  ;;  %v3149_v14 = vadd.f32 %v3138_v12, %v3123_v50  ;;  %v3472_v23 = vrot.slane %v3463_v29, %v4962_v5  ;;  %v5639_v50 = vld [vmem:[#allocation47_spill] sm:$0xff]  ;;  %v3480_v5 = vrot.slane %v3463_v29, %v5169_v30  ;;  %v4013_v30 = vld [vmem:[%s5586_s13] ss:$0 sm:$0xff]  ;;  %s4652_s13 = smov [#allocation18]  }
 0x8e4   :  { %v3148_v2 = vadd.f32 %v3134_v38, %v3122_v55  ;;  %v3150_v49 = vadd.f32 %v3142_v11, %v3124_v58  ;;  %v5637_v38 = vld [vmem:[#allocation46_spill] sm:$0xff]  ;;  %v3476_v63 = vrot.slane %v3463_v29, %v5166_v28  ;;  %s3673_s22 = sshll.u32 %s4652_s13, 4  ;;  %s3674_s22 = int_to_ptr.vmem [resolvable:$true] %s3673_s22 }
 0x8e5   :  { %v3975_v9 = vmul.f32 -1.442695, %v3147_v62  ;;  %s4604_s24 = scalar_lea.vmem %s3674_s22, 896  ;;  %p4609_p9 = scmp.lt.s32.totalorder %s3674_s22, %s3674_s22 }
 0x8e6   :  { %v3976_v10 = vmul.f32 -1.442695, %v3148_v2  ;;  %v3977_v13 = vmul.f32 -1.442695, %v3150_v49  ;;  %p4605_p8 = scmp.ne.s32.totalorder %s3674_s22, %s4604_s24  ;;  %p4610_p10 = scmp.lt.s32.totalorder %s4604_s24, %s4604_s24 }
 0x8e7   :  { %4396 = vpow2.f32 %v3975_v9 }
 0x8e8   :  { %4398 = vpow2.f32 %v3976_v10  ;;  %p4611_p11 = por %p4610_p10, %p4609_p9 }
 0x8e9   :  { %4400 = vpow2.f32 %v3977_v13 }
 0x8ea   :  { %4402 = vtanh.f32 %v3149_v14  ;;  %p4612_p12 = pnand %p4611_p11, %p4605_p8 }
 0x8f1   :  { %v4397_v54 = vpop.eup %4396 }
 0x8f2   :  { %v4399_v15 = vpop.eup %4398  ;;  %v3154_v46 = vadd.f32 1.0, %v4397_v54 }
 0x8f3   :  { %v3160_v47 = vadd.f32 1.0, %v4399_v15  ;;  %v4401_v48 = vpop.eup %4400 }
 0x8f4   :  { %4404 = vrcp.f32 %v3154_v46  ;;  %v4403_v6 = vpop.eup %4402  ;;  %v3167_v51 = vadd.f32 1.0, %v4401_v48 }
 0x8f5   :  { %4406 = vrcp.f32 %v3160_v47 }
 0x8f6   :  { %4408 = vrcp.f32 %v3167_v51 }
 0x8fe   :  { %v4405_v16 = vpop.eup %4404 }
 0x8ff   :  { %v4407_v33 = vpop.eup %4406  ;;  %v3171_v26 = vmul.f32 %v4405_v16, %v4403_v6 }
 0x900   :  { %v3170_v52 = vmul.f32 %v4407_v33, %v5487_v35  ;;  %v4409_v45 = vpop.eup %4408  ;;  %v3523_v35 = vpack.c.bf16 %v5437_v1, %v5635_v21 }
 0x902   :  { %v5538_v18 = vadd.f32 %v3171_v26, %v3170_v52 }
 0x904   :  { %4410 = vtanh.f32 %v5538_v18 }
 0x90e   :  { %v4411_v37 = vpop.eup %4410 }
 0x90f   :  { %v3174_v25 = vmul.f32 %v4411_v37, %v4409_v45 }
 0x911   :  { %v3184_v24 = vpack.c.bf16 %v3174_v25, %v3174_v25  ;;  %v3524_v39 = vpack.c.bf16 %v3174_v25, %v5490_v40 }
 0x913   :  { %3410 = vmatmul.mubr.bf16.vlgmr.msra.gmra.mrb[44].mxu1 %v3184_v24  ;;  %3451 = vmatmul.mubr.bf16.vlgmr.msra.gmra.mrb[48].mxu0 %v3184_v24 }
 0x914   :  { %4079 = vmatpush3.bf16.msra.mxu1 %v4308_v42  ;;  %4094 = vmatprep.mubr.bf16.mxu1 %v3522_v60 }
 0x915   :  { %4080 = vmatprep.subr.bf16.mxu1 %v4309_v7 }
 0x918   :  { %4081 = vmatpush3.bf16.msra.mxu1 %v4309_v7 }
 0x919   :  { %4082 = vmatprep.subr.bf16.mxu1 %v4310_v41 }
 0x91c   :  { %4083 = vmatpush3.bf16.msra.mxu1 %v4310_v41 }
 0x91d   :  { %4084 = vmatprep.subr.bf16.mxu1 %v4311_v34 }
 0x920   :  { %4085 = vmatpush3.bf16.msra.mxu1 %v4311_v34 }
 0x921   :  { %4086 = vmatprep.subr.bf16.mxu1 %v4312_v17 }
 0x924   :  { %4087 = vmatpush3.bf16.msra.mxu1 %v4312_v17 }
 0x925   :  { %4088 = vmatprep.subr.bf16.mxu1 %v4313_v19 }
 0x928   :  { %4089 = vmatpush3.bf16.msra.mxu1 %v4313_v19 }
 0x929   :  { %4090 = vmatprep.subr.bf16.mxu1 %v4314_v4 }
 0x92c   :  { %4091 = vmatpush3.bf16.msra.mxu1 %v4314_v4 }
 0x92d   :  { %4092 = vmatprep.subr.bf16.mxu1 %v4315_v43 }
 0x930   :  { %4093 = vmatpush3.bf16.msra.mxu1 %v4315_v43 }
 0x933   :  { %4095 = vmatmul.mubr.bf16.vlgmr.msra.gmra.mrb[48].mxu1 %v3523_v35 }
 0x934   :  { %4098 = vmatprep.mubr.bf16.mxu1 %v3524_v39 }
 0x9e6   :  { %v3411_v42 = vpop.f32.mrb[44].mxu1  ;;  %v3452_v22 = vpop.f32.mrb[48].mxu0 }
 0x9e7   :  { %v3459_v31 = vadd.f32 %v3411_v42, %v5636_v36  ;;  %v3461_v56 = vadd.f32 %v3452_v22, %v5637_v38  ;;  %v3413_v8 = vpop.f32.mrb[45].mxu1  ;;  %v3454_v1 = vpop.f32.mrb[49].mxu0 }
 0x9e8   :  { %v3460_v40 = vadd.f32 %v3413_v8, %v5638_v44  ;;  %v3462_v20 = vadd.f32 %v3454_v1, %v5639_v50  ;;  %v3415_v32 = vpop.f32.mrb[46].mxu1  ;;  %v3456_v53 = vpop.f32.mrb[50].mxu0 }
 0x9e9   :  { %v3485_v55 = vadd.f32 %v3468_v27, %v3459_v31  ;;  %v3416_v57 = vpop.f32.mrb[47].mxu1  ;;  %v3457_v58 = vpop.f32.mrb[51].mxu0  ;;  %v3487_v2 = vadd.f32 %v3476_v63, %v3461_v56 }
 0x9ea   :  { %v3486_v3 = vadd.f32 %v3472_v23, %v3460_v40  ;;  %v3488_v62 = vadd.f32 %v3480_v5, %v3462_v20 }
 0x9eb   :  { %v4010_v59 = vmul.f32 -1.442695, %v3485_v55 }
 0x9ec   :  { %v4011_v61 = vmul.f32 -1.442695, %v3486_v3  ;;  %v4012_v0 = vmul.f32 -1.442695, %v3488_v62 }
 0x9ed   :  { %4412 = vpow2.f32 %v4010_v59 }
 0x9ee   :  { %4414 = vpow2.f32 %v4011_v61 }
 0x9ef   :  { %4416 = vpow2.f32 %v4012_v0 }
 0x9f0   :  { %4418 = vtanh.f32 %v3487_v2 }
 0x9f7   :  { %v4413_v9 = vpop.eup %4412 }
 0x9f8   :  { %v4415_v10 = vpop.eup %4414  ;;  %v3492_v11 = vadd.f32 1.0, %v4413_v9 }
 0x9f9   :  { %v3498_v49 = vadd.f32 1.0, %v4415_v10  ;;  %v4417_v12 = vpop.eup %4416 }
 0x9fa   :  { %4420 = vrcp.f32 %v3492_v11  ;;  %v4419_v13 = vpop.eup %4418  ;;  %v3505_v28 = vadd.f32 1.0, %v4417_v12 }
 0x9fb   :  { %4422 = vrcp.f32 %v3498_v49 }
 0x9fc   :  { %4424 = vrcp.f32 %v3505_v28 }
 0xa04   :  { %v4421_v14 = vpop.eup %4420 }
 0xa05   :  { %v4423_v54 = vpop.eup %4422  ;;  %v3509_v15 = vmul.f32 %v4421_v14, %v4419_v13 }
 0xa06   :  { %v3508_v46 = vmul.f32 %v4423_v54, %v5538_v18  ;;  %v4096_v47 = vpop.f32.mrb[48].mxu1  ;;  %v4425_v37 = vpop.eup %4424 }
 0xa07   :  { %v3640_v48 = vadd.f32 %v4096_v47, %v4013_v30  ;;  %v3631_v6 = vpop.f32.mrb[49].mxu1 }
 0xa08   :  { %v3632_v16 = vadd.f32 %v4013_v30, %v3631_v6  ;;  %v4097_v33 = vpop.f32.mrb[50].mxu1  ;;  %v3510_v26 = vadd.f32 %v3509_v15, %v3508_v46 }
 0xa09   :  { %3663 = vst [vmem:[#allocation18 + $0x10] sm:$0xff] %v3640_v48  ;;  %v3643_v51 = vadd.f32 %v4097_v33, %v4013_v30  ;;  %v3634_v52 = vpop.f32.mrb[51].mxu1 }
 0xa0a   :  { %3661 = vst [vmem:[#allocation18] sm:$0xff] %v3632_v16  ;;  %v3635_v45 = vadd.f32 %v4013_v30, %v3634_v52  ;;  %4426 = vtanh.f32 %v3510_v26 }
 0xa0b   :  { %3664 = vst [vmem:[#allocation18 + $0x18] sm:$0xff] %v3643_v51 }
 0xa0c   :  { %3662 = vst [vmem:[#allocation18 + $0x8] sm:$0xff] %v3635_v45 }
 0xa14   :  { %v4427_v25 = vpop.eup %4426 }
 0xa15   :  { %v3512_v24 = vmul.f32 %v4427_v25, %v4425_v37 }
 0xa17   :  { %v3525_v7 = vpack.c.bf16 %v3512_v24, %v3512_v24 }
 0xa19   :  { %4099 = vmatmul.mubr.bf16.gmra.mrb[52].mxu1 %v3525_v7 }
 0xaec   :  { %v4100_v18 = vpop.f32.mrb[52].mxu1 }
 0xaed   :  { %v3656_v60 = vadd.f32 %v4100_v18, %v4013_v30  ;;  %v3647_v41 = vpop.f32.mrb[53].mxu1 }
 0xaee   :  { %v3648_v34 = vadd.f32 %v4013_v30, %v3647_v41  ;;  %v4101_v17 = vpop.f32.mrb[54].mxu1 }
 0xaef   :  { %3667 = vst [vmem:[#allocation18 + $0x30] sm:$0xff] %v3656_v60  ;;  %v3650_v19 = vpop.f32.mrb[55].mxu1 }
 0xaf0   :  { %3665 = vst [vmem:[#allocation18 + $0x20] sm:$0xff] %v3648_v34  ;;  %v3651_v4 = vadd.f32 %v4013_v30, %v3650_v19 }
 0xaf2   :  { %3666 = vst [vmem:[#allocation18 + $0x28] sm:$0xff] %v3651_v4 }
 0xaf3   :  { %4615 = shalt.err (!%p4612_p12)
}
 0xaf4   :  { %s4616_s4 = scalar_lea.hbm %s5587_s14, 896 }
 0xaf5   :  { %p4617_p13 = scmp.ne.s32.totalorder %s5587_s14, %s4616_s4  ;;  %p4620_p0 = scmp.lt.u32.totalorder %s4616_s4, %s5587_s14 }
 0xaf7   :  { %p4622_p1 = pnand %p4620_p0, %p4617_p13 }
 0xaf9   :  { %4625 = shalt.err (!%p4622_p1)
}
 0xafa   :  { %s4653_s3 = smov 128   ;;  %s4654_s29 = smov 8  }
 0xafb   :  { %3679 = dma.vmem_to_hbm [thread:$0]  %s3674_s22, 896, %s5587_s14, [#allocation6], %s4653_s3, %s4653_s3, %s4654_s29  }
 0xafc   :  { %4636 = dma.done.wait [#allocation6], 896  }
 0xafd   :  { %4637 = vsyncadd [#allocation6], 4294966400 }
 0xafe   :  { %3683 = vsyncpa [#allocation5], 1 }
 0xaff   :  { %3684 = vsyncpa [#allocation8], 1 }
 0xb00   :  { %3685 = vsyncpa [#allocation11], 1 }
 0xb01   :  { %3686 = vsyncpa [#allocation14], 1 }
 0xb02   :  { %3687 = vsyncpa [#allocation17], 1 }
 0xb03   :  { %3688 = vsyncpa [#allocation6], 1 }

</bundles_post_ra>
